<compile_context>
chip_gen: v6e
topology: v6e:2x2x1
jax: 0.10.0
libtpu: 0.0.40
codegen_flags: <defaults>
</compile_context>

<pallas_src>
import functools
import math

import jax
import jax.numpy as jnp
from jax.experimental import pallas as pl
from jax.experimental.pallas import tpu as pltpu


def _global_graph_kernel(target_ref, map_ref, w_in_ref, w_out_ref, b_in_ref, b_out_ref,
                         target_out_ref, map_out_ref, *, n_layers, scale):
    """Fused GlobalGraph layer(s) for one batch block.

    target_ref: (Bb, 1, Hp)    map_ref: (Bb, Nm, Hp)     (Hp = H zero-padded to 128*k)
    w_in_ref:   (Hp, 9*Hp) bf16, column blocks:
                [Wq_a2m|Wk_a2m|Wv_a2m|Wq_ag|Wk_ag|Wv_ag|Wq_m2a|Wk_m2a|Wv_m2a]
    w_out_ref:  (2*Hp, 2*Hp) bf16: [[Wo_a2m, Wo_ag], [0, Wo_m2a]]
    b_in_ref:   (1, 9*Hp) f32 (same block order as w_in)
    b_out_ref:  (1, 2*Hp) f32: [bo_a2m | bo_ag + bo_m2a]
    Semantics per attention match torch.nn.MultiheadAttention(num_heads=1,
    batch_first=True): softmax((xWq+bq)(xWk+bk)^T / sqrt(H)) (xWv+bv) Wo + bo.
    """
    Bb, _, Hp = target_ref.shape
    Nm = map_ref.shape[1]
    f32, bf16 = jnp.float32, jnp.bfloat16

    tgt = target_ref[...].reshape(Bb, Hp).astype(f32)       # (Bb, Hp)
    mp = map_ref[...].astype(f32)                           # (Bb, Nm, Hp)

    for _ in range(n_layers):
        # ---- fused input projections (bf16 MXU operands, f32 accumulation) ----
        mp2 = mp.reshape(Bb * Nm, Hp)
        mp_proj = jnp.dot(mp2.astype(bf16), w_in_ref[:, 0:3 * Hp],
                          preferred_element_type=f32) + b_in_ref[:, 0:3 * Hp]
        tgt_proj = jnp.dot(tgt.astype(bf16), w_in_ref[:, Hp:7 * Hp],
                           preferred_element_type=f32) + b_in_ref[:, Hp:7 * Hp]

        # 128-aligned activation slices (no intra-vreg lane cuts).
        q_a2m = (mp_proj[:, 0:Hp] * scale).reshape(Bb, Nm, Hp)
        k_a2m_m = mp_proj[:, Hp:2 * Hp].reshape(Bb, Nm, Hp)
        v_a2m_m = mp_proj[:, 2 * Hp:3 * Hp].reshape(Bb, Nm, Hp)
        k_a2m_t = tgt_proj[:, 0:Hp].reshape(Bb, 1, Hp)
        v_a2m_t = tgt_proj[:, Hp:2 * Hp].reshape(Bb, 1, Hp)
        q_ag = (tgt_proj[:, 2 * Hp:3 * Hp] * scale).reshape(Bb, 1, Hp)
        k_ag = tgt_proj[:, 3 * Hp:4 * Hp].reshape(Bb, 1, Hp)
        v_ag = tgt_proj[:, 4 * Hp:5 * Hp].reshape(Bb, 1, Hp)
        q_m2a = (tgt_proj[:, 5 * Hp:6 * Hp] * scale).reshape(Bb, 1, Hp)

        # ---- a2m: map queries over [target ; map] (two-block exact softmax, f32) ----
        s_t = jnp.einsum('bqd,bkd->bqk', q_a2m, k_a2m_t, preferred_element_type=f32)
        s_m = jnp.einsum('bqd,bkd->bqk', q_a2m, k_a2m_m, preferred_element_type=f32)
        m = jnp.maximum(s_t.max(-1, keepdims=True), s_m.max(-1, keepdims=True))
        p_t = jnp.exp(s_t - m)
        p_m = jnp.exp(s_m - m)
        denom = p_t.sum(-1, keepdims=True) + p_m.sum(-1, keepdims=True)
        ctx_a2m = (jnp.einsum('bqk,bkd->bqd', p_t, v_a2m_t, preferred_element_type=f32)
                   + jnp.einsum('bqk,bkd->bqd', p_m, v_a2m_m,
                                preferred_element_type=f32)) / denom
        a2m_out = jnp.dot(ctx_a2m.reshape(Bb * Nm, Hp).astype(bf16),
                          w_out_ref[0:Hp, 0:Hp],
                          preferred_element_type=f32) + b_out_ref[:, 0:Hp]
        mp = mp + a2m_out.reshape(Bb, Nm, Hp)                # residual into map

        # ---- m2a K/V from the UPDATED map (torch ordering preserved) ----
        kv_m2a = jnp.dot(mp.reshape(Bb * Nm, Hp).astype(bf16), w_in_ref[:, 7 * Hp:9 * Hp],
                         preferred_element_type=f32) + b_in_ref[:, 7 * Hp:9 * Hp]
        k_m2a = kv_m2a[:, 0:Hp].reshape(Bb, Nm, Hp)
        v_m2a = kv_m2a[:, Hp:2 * Hp].reshape(Bb, Nm, Hp)

        # ---- agent self-attention (target length 1; kept in general form) ----
        s_ag = jnp.einsum('bqd,bkd->bqk', q_ag, k_ag, preferred_element_type=f32)
        p_ag = jnp.exp(s_ag - s_ag.max(-1, keepdims=True))
        ctx_ag = jnp.einsum('bqk,bkd->bqd', p_ag, v_ag,
                            preferred_element_type=f32) / p_ag.sum(-1, keepdims=True)

        # ---- m2a: target attends over the updated map ----
        s_m2a = jnp.einsum('bqd,bkd->bqk', q_m2a, k_m2a, preferred_element_type=f32)
        p_m2a = jnp.exp(s_m2a - s_m2a.max(-1, keepdims=True))
        ctx_m2a = jnp.einsum('bqk,bkd->bqd', p_m2a, v_m2a,
                             preferred_element_type=f32) / p_m2a.sum(-1, keepdims=True)

        # ---- fused output projection for target: [ctx_ag | ctx_m2a] @ [Wo_ag ; Wo_m2a]
        ctx_cat = jnp.concatenate([ctx_ag.reshape(Bb, Hp), ctx_m2a.reshape(Bb, Hp)],
                                  axis=-1)                    # (Bb, 2*Hp), 128-aligned
        tgt = jnp.dot(ctx_cat.astype(bf16), w_out_ref[:, Hp:2 * Hp],
                      preferred_element_type=f32) + b_out_ref[:, Hp:2 * Hp]

    # Lane-dense (last dim = Hp, multiple of 128) unmasked stores.
    target_out_ref[...] = tgt.reshape(Bb, 1, Hp).astype(target_out_ref.dtype)
    map_out_ref[...] = mp.astype(map_out_ref.dtype)


def _pack_params(params, hidden_dim, hp):
    """Pack the three attention modules, zero-padded H->Hp, weights in bf16."""
    H, Hp = hidden_dim, hp

    def padw(w):
        return jnp.zeros((Hp, Hp), jnp.float32).at[:H, :H].set(w)

    def padb(b):
        return jnp.zeros((1, Hp), jnp.float32).at[:, :H].set(b.reshape(1, H))

    a2m, ag, m2a = params["a2m"], params["agent"], params["m2a"]
    w_in = jnp.concatenate(
        [padw(a2m["wq"]), padw(a2m["wk"]), padw(a2m["wv"]),
         padw(ag["wq"]), padw(ag["wk"]), padw(ag["wv"]),
         padw(m2a["wq"]), padw(m2a["wk"]), padw(m2a["wv"])],
        axis=1).astype(jnp.bfloat16)                                  # (Hp, 9*Hp)
    b_in = jnp.concatenate(
        [padb(a2m["bq"]), padb(a2m["bk"]), padb(a2m["bv"]),
         padb(ag["bq"]), padb(ag["bk"]), padb(ag["bv"]),
         padb(m2a["bq"]), padb(m2a["bk"]), padb(m2a["bv"])], axis=1)  # (1, 9*Hp) f32

    w_out = jnp.zeros((2 * Hp, 2 * Hp), jnp.float32)
    w_out = w_out.at[:H, :H].set(a2m["wo"])                 # map  out:  Wo_a2m
    w_out = w_out.at[:H, Hp:Hp + H].set(ag["wo"])           # tgt  out:  Wo_agent (rows 0:Hp)
    w_out = w_out.at[Hp:Hp + H, Hp:Hp + H].set(m2a["wo"])   #            Wo_m2a   (rows Hp:2Hp)
    w_out = w_out.astype(jnp.bfloat16)                                # (2*Hp, 2*Hp)
    b_out = jnp.concatenate([padb(a2m["bo"]), padb(ag["bo"] + m2a["bo"])], axis=1)
    return w_in, w_out, b_in, b_out                                   # b_out: (1, 2*Hp) f32


def global_graph_forward(agent_embedding, map_embedding, params, global_layer=1,
                         batch_block=None):
    """Pallas equivalent of GlobalGraph.forward.

    agent_embedding: (B, Na, H), map_embedding: (B, Nm, H)
      -> (target_agent_embedding (B, 1, H), map_embedding (B, Nm, H)).
    """
    B, _, H = agent_embedding.shape
    Nm = map_embedding.shape[1]
    Hp = ((H + 127) // 128) * 128                  # lane-aligned hidden dim
    if batch_block is None:
        batch_block = B                            # single block at toy shapes
    nb = pl.cdiv(B, batch_block)

    target = agent_embedding[:, :1]                                   # (B, 1, H)
    tgt_pad = jnp.pad(target, ((0, 0), (0, 0), (0, Hp - H)))
    map_pad = jnp.pad(map_embedding, ((0, 0), (0, 0), (0, Hp - H)))
    w_in, w_out, b_in, b_out = _pack_params(params, H, Hp)
    scale = 1.0 / math.sqrt(H)                     # true (unpadded) head dim

    kernel = functools.partial(_global_graph_kernel,
                               n_layers=global_layer, scale=scale)
    target_out, map_out = pl.pallas_call(
        kernel,
        out_shape=(jax.ShapeDtypeStruct((B, 1, Hp), jnp.float32),
                   jax.ShapeDtypeStruct((B, Nm, Hp), jnp.float32)),
        grid=(nb,),
        in_specs=[
            pl.BlockSpec((batch_block, 1, Hp), lambda b: (b, 0, 0)),
            pl.BlockSpec((batch_block, Nm, Hp), lambda b: (b, 0, 0)),
            pl.BlockSpec((Hp, 9 * Hp), lambda b: (0, 0)),
            pl.BlockSpec((2 * Hp, 2 * Hp), lambda b: (0, 0)),
            pl.BlockSpec((1, 9 * Hp), lambda b: (0, 0)),
            pl.BlockSpec((1, 2 * Hp), lambda b: (0, 0)),
        ],
        out_specs=(pl.BlockSpec((batch_block, 1, Hp), lambda b: (b, 0, 0)),
                   pl.BlockSpec((batch_block, Nm, Hp), lambda b: (b, 0, 0))),
        # Batch blocks are independent -> shardable across v7x's two TensorCores.
        compiler_params=pltpu.CompilerParams(dimension_semantics=("parallel",)),
    )(tgt_pad, map_pad, w_in, w_out, b_in, b_out)
    # Strip the hidden-dim padding back to H (cheap XLA slice outside the kernel).
    return target_out[:, :, :H], map_out[:, :, :H]


def init_mha_params(key, hidden_dim):
    ks = jax.random.split(key, 8)
    std = 1.0 / math.sqrt(hidden_dim)

    def w(k):
        return jax.random.normal(k, (hidden_dim, hidden_dim), jnp.float32) * std

    def b(k):
        return jax.random.normal(k, (1, hidden_dim), jnp.float32) * 0.01

    return {
        "wq": w(ks[0]), "wk": w(ks[1]), "wv": w(ks[2]), "wo": w(ks[3]),
        "bq": b(ks[4]), "bk": b(ks[5]), "bv": b(ks[6]), "bo": b(ks[7]),
    }


# ------------------------- pure-JAX reference (for checking) -------------------------
def _mha_ref(q, kv, p):
    H = q.shape[-1]
    qp = jnp.einsum('bld,de->ble', q, p["wq"]) + p["bq"].reshape(1, 1, H)
    kp = jnp.einsum('bld,de->ble', kv, p["wk"]) + p["bk"].reshape(1, 1, H)
    vp = jnp.einsum('bld,de->ble', kv, p["wv"]) + p["bv"].reshape(1, 1, H)
    s = jnp.einsum('bqd,bkd->bqk', qp, kp) / math.sqrt(H)
    a = jax.nn.softmax(s, axis=-1)
    ctx = jnp.einsum('bqk,bkd->bqd', a, vp)
    return jnp.einsum('bqd,de->bqe', ctx, p["wo"]) + p["bo"].reshape(1, 1, H)


def _global_graph_ref(agent_embedding, map_embedding, params, global_layer=1):
    target = agent_embedding[:, :1]
    mp = map_embedding
    for _ in range(global_layer):
        kv = jnp.concatenate([target, mp], axis=1)
        mp = mp + _mha_ref(mp, kv, params["a2m"])
        target = _mha_ref(target, target, params["agent"]) + _mha_ref(target, mp, params["m2a"])
    return target, mp


if __name__ == "__main__":
    B, N_AGENT, N_MAP, HIDDEN = 2, 4, 8, 32

    root = jax.random.PRNGKey(0)
    k_agent, k_map, k_p1, k_p2, k_p3 = jax.random.split(root, 5)

    agent_embedding = jax.random.normal(k_agent, (B, N_AGENT, HIDDEN), jnp.float32)
    map_embedding = jax.random.normal(k_map, (B, N_MAP, HIDDEN), jnp.float32)

    params = {
        "a2m": init_mha_params(k_p1, HIDDEN),
        "agent": init_mha_params(k_p2, HIDDEN),
        "m2a": init_mha_params(k_p3, HIDDEN),
    }

    target_out, map_out = jax.jit(global_graph_forward)(
        agent_embedding, map_embedding, params)
    jax.block_until_ready((target_out, map_out))

    assert target_out.shape == (B, 1, HIDDEN)
    assert map_out.shape == (B, N_MAP, HIDDEN)
    assert bool(jnp.all(jnp.isfinite(target_out))) and bool(jnp.all(jnp.isfinite(map_out)))

    # Check against the pure-f32 JAX reference. Softmax/divide are exact in the kernel;
    # the residual tolerance comes from bf16 MXU weights/activations (f32 accumulation).
    ref_target, ref_map = _global_graph_ref(agent_embedding, map_embedding, params)
    assert bool(jnp.allclose(target_out, ref_target, atol=3e-2, rtol=3e-2))
    assert bool(jnp.allclose(map_out, ref_map, atol=3e-2, rtol=3e-2))

    print("KERNEL_OK")
</pallas_src>

<mosaic_0001>
module attributes {stable_mosaic.version = 11 : i64} {
  func.func @_global_graph_kernel(%arg0: i32, %arg1: memref<2x1x128xf32, #tpu.memory_space<vmem>>, %arg2: memref<2x8x128xf32, #tpu.memory_space<vmem>>, %arg3: memref<128x1152xbf16, #tpu.memory_space<vmem>>, %arg4: memref<256x256xbf16, #tpu.memory_space<vmem>>, %arg5: memref<1x1152xf32, #tpu.memory_space<vmem>>, %arg6: memref<1x256xf32, #tpu.memory_space<vmem>>, %arg7: memref<2x1x128xf32, #tpu.memory_space<vmem>>, %arg8: memref<2x8x128xf32, #tpu.memory_space<vmem>>) attributes {dimension_semantics = [#tpu.dimension_semantics<parallel>], iteration_bounds = array<i64: 1>, scalar_prefetch = 0 : i64, scratch_operands = 0 : i64, tpu.core_type = #tpu.core_type<tc>, window_params = [{transform_indices = @transform_0, window_bounds = array<i64: 2, 1, 128>}, {transform_indices = @transform_1, window_bounds = array<i64: 2, 8, 128>}, {pipeline_mode = #tpu.pipeline_mode<synchronous>, transform_indices = @transform_2, window_bounds = array<i64: 128, 1152>}, {pipeline_mode = #tpu.pipeline_mode<synchronous>, transform_indices = @transform_3, window_bounds = array<i64: 256, 256>}, {pipeline_mode = #tpu.pipeline_mode<synchronous>, transform_indices = @transform_4, window_bounds = array<i64: 1, 1152>}, {pipeline_mode = #tpu.pipeline_mode<synchronous>, transform_indices = @transform_5, window_bounds = array<i64: 1, 256>}, {transform_indices = @transform_6, window_bounds = array<i64: 2, 1, 128>}, {transform_indices = @transform_7, window_bounds = array<i64: 2, 8, 128>}]} {
    %c0 = arith.constant 0 : index
    %c0_0 = arith.constant 0 : index
    %c0_1 = arith.constant 0 : index
    %0 = vector.load %arg1[%c0, %c0_0, %c0_1] : memref<2x1x128xf32, #tpu.memory_space<vmem>>, vector<2x1x128xf32>
    %1 = vector.shape_cast %0 : vector<2x1x128xf32> to vector<2x128xf32>
    %c0_2 = arith.constant 0 : index
    %c0_3 = arith.constant 0 : index
    %c0_4 = arith.constant 0 : index
    %2 = vector.load %arg2[%c0_2, %c0_3, %c0_4] : memref<2x8x128xf32, #tpu.memory_space<vmem>>, vector<2x8x128xf32>
    %3 = vector.shape_cast %2 : vector<2x8x128xf32> to vector<16x128xf32>
    %4 = arith.truncf %3 : vector<16x128xf32> to vector<16x128xbf16>
    %c0_5 = arith.constant 0 : index
    %c0_6 = arith.constant 0 : index
    %5 = vector.load %arg3[%c0_5, %c0_6] : memref<128x1152xbf16, #tpu.memory_space<vmem>>, vector<128x384xbf16>
    %cst = arith.constant dense<0.000000e+00> : vector<16x384xf32>
    %6 = tpu.matmul %4, %5, %cst {dimension_numbers = #tpu.dot_dimension_numbers<[1], [0], [0], [1], [0, 0, 1, 1], [], []>} : vector<16x128xbf16>, vector<128x384xbf16>, vector<16x384xf32> -> vector<16x384xf32>
    %c0_7 = arith.constant 0 : index
    %c0_8 = arith.constant 0 : index
    %7 = vector.load %arg5[%c0_7, %c0_8] : memref<1x1152xf32, #tpu.memory_space<vmem>>, vector<1x384xf32>
    %8 = vector.broadcast %7 : vector<1x384xf32> to vector<16x384xf32>
    %9 = arith.addf %6, %8 : vector<16x384xf32>
    %10 = arith.truncf %1 : vector<2x128xf32> to vector<2x128xbf16>
    %c0_9 = arith.constant 0 : index
    %c128 = arith.constant 128 : index
    %11 = vector.load %arg3[%c0_9, %c128] : memref<128x1152xbf16, #tpu.memory_space<vmem>>, vector<128x768xbf16>
    %cst_10 = arith.constant dense<0.000000e+00> : vector<2x768xf32>
    %12 = tpu.matmul %10, %11, %cst_10 {dimension_numbers = #tpu.dot_dimension_numbers<[1], [0], [0], [1], [0, 0, 1, 1], [], []>} : vector<2x128xbf16>, vector<128x768xbf16>, vector<2x768xf32> -> vector<2x768xf32>
    %c0_11 = arith.constant 0 : index
    %c128_12 = arith.constant 128 : index
    %13 = vector.load %arg5[%c0_11, %c128_12] : memref<1x1152xf32, #tpu.memory_space<vmem>>, vector<1x768xf32>
    %14 = vector.broadcast %13 : vector<1x768xf32> to vector<2x768xf32>
    %15 = arith.addf %12, %14 : vector<2x768xf32>
    %16 = vector.extract_strided_slice %9 {offsets = [0, 0], sizes = [16, 128], strides = [1, 1]} : vector<16x384xf32> to vector<16x128xf32>
    %cst_13 = arith.constant 0.176776692 : f32
    %17 = vector.broadcast %cst_13 : f32 to vector<16x128xf32>
    %18 = arith.mulf %16, %17 : vector<16x128xf32>
    %19 = vector.shape_cast %18 : vector<16x128xf32> to vector<2x8x128xf32>
    %20 = vector.extract_strided_slice %9 {offsets = [0, 128], sizes = [16, 128], strides = [1, 1]} : vector<16x384xf32> to vector<16x128xf32>
    %21 = vector.shape_cast %20 : vector<16x128xf32> to vector<2x8x128xf32>
    %22 = vector.extract_strided_slice %9 {offsets = [0, 256], sizes = [16, 128], strides = [1, 1]} : vector<16x384xf32> to vector<16x128xf32>
    %23 = vector.shape_cast %22 : vector<16x128xf32> to vector<2x8x128xf32>
    %24 = vector.extract_strided_slice %15 {offsets = [0, 0], sizes = [2, 128], strides = [1, 1]} : vector<2x768xf32> to vector<2x128xf32>
    %25 = vector.shape_cast %24 : vector<2x128xf32> to vector<2x1x128xf32>
    %26 = vector.extract_strided_slice %15 {offsets = [0, 128], sizes = [2, 128], strides = [1, 1]} : vector<2x768xf32> to vector<2x128xf32>
    %27 = vector.shape_cast %26 : vector<2x128xf32> to vector<2x1x128xf32>
    %28 = vector.extract_strided_slice %15 {offsets = [0, 256], sizes = [2, 128], strides = [1, 1]} : vector<2x768xf32> to vector<2x128xf32>
    %cst_14 = arith.constant 0.176776692 : f32
    %29 = vector.broadcast %cst_14 : f32 to vector<2x128xf32>
    %30 = arith.mulf %28, %29 : vector<2x128xf32>
    %31 = vector.shape_cast %30 : vector<2x128xf32> to vector<2x1x128xf32>
    %32 = vector.extract_strided_slice %15 {offsets = [0, 384], sizes = [2, 128], strides = [1, 1]} : vector<2x768xf32> to vector<2x128xf32>
    %33 = vector.shape_cast %32 : vector<2x128xf32> to vector<2x1x128xf32>
    %34 = vector.extract_strided_slice %15 {offsets = [0, 512], sizes = [2, 128], strides = [1, 1]} : vector<2x768xf32> to vector<2x128xf32>
    %35 = vector.shape_cast %34 : vector<2x128xf32> to vector<2x1x128xf32>
    %36 = vector.extract_strided_slice %15 {offsets = [0, 640], sizes = [2, 128], strides = [1, 1]} : vector<2x768xf32> to vector<2x128xf32>
    %cst_15 = arith.constant 0.176776692 : f32
    %37 = vector.broadcast %cst_15 : f32 to vector<2x128xf32>
    %38 = arith.mulf %36, %37 : vector<2x128xf32>
    %39 = vector.shape_cast %38 : vector<2x128xf32> to vector<2x1x128xf32>
    "tpu.trace_start"() <{level = 10 : i32, message = "bqd,bkd->bqk"}> : () -> ()
    %cst_16 = arith.constant dense<0.000000e+00> : vector<2x8x1xf32>
    %40 = tpu.matmul %19, %25, %cst_16 {dimension_numbers = #tpu.dot_dimension_numbers<[2], [2], [1], [1], [0, 0, 0, 1, 1, 1], [0], [0]>} : vector<2x8x128xf32>, vector<2x1x128xf32>, vector<2x8x1xf32> -> vector<2x8x1xf32>
    %cst_17 = arith.constant dense<0.000000e+00> : vector<2x8x8xf32>
    %41 = tpu.matmul %19, %21, %cst_17 {dimension_numbers = #tpu.dot_dimension_numbers<[2], [2], [1], [1], [0, 0, 0, 1, 1, 1], [0], [0]>} : vector<2x8x128xf32>, vector<2x8x128xf32>, vector<2x8x8xf32> -> vector<2x8x8xf32>
    "tpu.trace_stop"() : () -> ()
    %cst_18 = arith.constant dense<0xFF800000> : vector<2x8xf32>
    %42 = vector.multi_reduction <maximumf>, %40, %cst_18 [2] : vector<2x8x1xf32> to vector<2x8xf32>
    %43 = vector.shape_cast %42 : vector<2x8xf32> to vector<2x8x1xf32>
    %cst_19 = arith.constant dense<0xFF800000> : vector<2x8xf32>
    %44 = vector.multi_reduction <maximumf>, %41, %cst_19 [2] : vector<2x8x8xf32> to vector<2x8xf32>
    %45 = vector.shape_cast %44 : vector<2x8xf32> to vector<2x8x1xf32>
    %46 = arith.maximumf %43, %45 : vector<2x8x1xf32>
    %47 = arith.subf %40, %46 : vector<2x8x1xf32>
    %48 = math.exp %47 : vector<2x8x1xf32>
    %49 = vector.broadcast %46 : vector<2x8x1xf32> to vector<2x8x8xf32>
    %50 = arith.subf %41, %49 : vector<2x8x8xf32>
    %51 = math.exp %50 : vector<2x8x8xf32>
    %cst_20 = arith.constant dense<0.000000e+00> : vector<2x8xf32>
    %52 = vector.multi_reduction <add>, %48, %cst_20 [2] : vector<2x8x1xf32> to vector<2x8xf32>
    %53 = vector.shape_cast %52 : vector<2x8xf32> to vector<2x8x1xf32>
    %cst_21 = arith.constant dense<0.000000e+00> : vector<2x8xf32>
    %54 = vector.multi_reduction <add>, %51, %cst_21 [2] : vector<2x8x8xf32> to vector<2x8xf32>
    %55 = vector.shape_cast %54 : vector<2x8xf32> to vector<2x8x1xf32>
    %56 = arith.addf %53, %55 : vector<2x8x1xf32>
    "tpu.trace_start"() <{level = 10 : i32, message = "bqk,bkd->bqd"}> : () -> ()
    %cst_22 = arith.constant dense<0.000000e+00> : vector<2x8x128xf32>
    %57 = tpu.matmul %48, %27, %cst_22 {dimension_numbers = #tpu.dot_dimension_numbers<[2], [1], [1], [2], [0, 0, 0, 1, 1, 2], [0], [0]>} : vector<2x8x1xf32>, vector<2x1x128xf32>, vector<2x8x128xf32> -> vector<2x8x128xf32>
    %cst_23 = arith.constant dense<0.000000e+00> : vector<2x8x128xf32>
    %58 = tpu.matmul %51, %23, %cst_23 {dimension_numbers = #tpu.dot_dimension_numbers<[2], [1], [1], [2], [0, 0, 0, 1, 1, 2], [0], [0]>} : vector<2x8x8xf32>, vector<2x8x128xf32>, vector<2x8x128xf32> -> vector<2x8x128xf32>
    "tpu.trace_stop"() : () -> ()
    %59 = arith.addf %57, %58 : vector<2x8x128xf32>
    %60 = vector.broadcast %56 : vector<2x8x1xf32> to vector<2x8x128xf32>
    %61 = arith.divf %59, %60 : vector<2x8x128xf32>
    %62 = vector.shape_cast %61 : vector<2x8x128xf32> to vector<16x128xf32>
    %63 = arith.truncf %62 : vector<16x128xf32> to vector<16x128xbf16>
    %c0_24 = arith.constant 0 : index
    %c0_25 = arith.constant 0 : index
    %64 = vector.load %arg4[%c0_24, %c0_25] : memref<256x256xbf16, #tpu.memory_space<vmem>>, vector<128x128xbf16>
    %cst_26 = arith.constant dense<0.000000e+00> : vector<16x128xf32>
    %65 = tpu.matmul %63, %64, %cst_26 {dimension_numbers = #tpu.dot_dimension_numbers<[1], [0], [0], [1], [0, 0, 1, 1], [], []>} : vector<16x128xbf16>, vector<128x128xbf16>, vector<16x128xf32> -> vector<16x128xf32>
    %c0_27 = arith.constant 0 : index
    %c0_28 = arith.constant 0 : index
    %66 = vector.load %arg6[%c0_27, %c0_28] : memref<1x256xf32, #tpu.memory_space<vmem>>, vector<1x128xf32>
    %67 = vector.broadcast %66 : vector<1x128xf32> to vector<16x128xf32>
    %68 = arith.addf %65, %67 : vector<16x128xf32>
    %69 = vector.shape_cast %68 : vector<16x128xf32> to vector<2x8x128xf32>
    %70 = arith.addf %2, %69 : vector<2x8x128xf32>
    %71 = vector.shape_cast %70 : vector<2x8x128xf32> to vector<16x128xf32>
    %72 = arith.truncf %71 : vector<16x128xf32> to vector<16x128xbf16>
    %c0_29 = arith.constant 0 : index
    %c896 = arith.constant 896 : index
    %73 = vector.load %arg3[%c0_29, %c896] : memref<128x1152xbf16, #tpu.memory_space<vmem>>, vector<128x256xbf16>
    %cst_30 = arith.constant dense<0.000000e+00> : vector<16x256xf32>
    %74 = tpu.matmul %72, %73, %cst_30 {dimension_numbers = #tpu.dot_dimension_numbers<[1], [0], [0], [1], [0, 0, 1, 1], [], []>} : vector<16x128xbf16>, vector<128x256xbf16>, vector<16x256xf32> -> vector<16x256xf32>
    %c0_31 = arith.constant 0 : index
    %c896_32 = arith.constant 896 : index
    %75 = vector.load %arg5[%c0_31, %c896_32] : memref<1x1152xf32, #tpu.memory_space<vmem>>, vector<1x256xf32>
    %76 = vector.broadcast %75 : vector<1x256xf32> to vector<16x256xf32>
    %77 = arith.addf %74, %76 : vector<16x256xf32>
    %78 = vector.extract_strided_slice %77 {offsets = [0, 0], sizes = [16, 128], strides = [1, 1]} : vector<16x256xf32> to vector<16x128xf32>
    %79 = vector.shape_cast %78 : vector<16x128xf32> to vector<2x8x128xf32>
    %80 = vector.extract_strided_slice %77 {offsets = [0, 128], sizes = [16, 128], strides = [1, 1]} : vector<16x256xf32> to vector<16x128xf32>
    %81 = vector.shape_cast %80 : vector<16x128xf32> to vector<2x8x128xf32>
    "tpu.trace_start"() <{level = 10 : i32, message = "bqd,bkd->bqk"}> : () -> ()
    %cst_33 = arith.constant dense<0.000000e+00> : vector<2x1x1xf32>
    %82 = tpu.matmul %31, %33, %cst_33 {dimension_numbers = #tpu.dot_dimension_numbers<[2], [2], [1], [1], [0, 0, 0, 1, 1, 1], [0], [0]>} : vector<2x1x128xf32>, vector<2x1x128xf32>, vector<2x1x1xf32> -> vector<2x1x1xf32>
    "tpu.trace_stop"() : () -> ()
    %cst_34 = arith.constant dense<0xFF800000> : vector<2x1xf32>
    %83 = vector.multi_reduction <maximumf>, %82, %cst_34 [2] : vector<2x1x1xf32> to vector<2x1xf32>
    %84 = vector.shape_cast %83 : vector<2x1xf32> to vector<2x1x1xf32>
    %85 = arith.subf %82, %84 : vector<2x1x1xf32>
    %86 = math.exp %85 : vector<2x1x1xf32>
    "tpu.trace_start"() <{level = 10 : i32, message = "bqk,bkd->bqd"}> : () -> ()
    %cst_35 = arith.constant dense<0.000000e+00> : vector<2x1x128xf32>
    %87 = tpu.matmul %86, %35, %cst_35 {dimension_numbers = #tpu.dot_dimension_numbers<[2], [1], [1], [2], [0, 0, 0, 1, 1, 2], [0], [0]>} : vector<2x1x1xf32>, vector<2x1x128xf32>, vector<2x1x128xf32> -> vector<2x1x128xf32>
    "tpu.trace_stop"() : () -> ()
    %cst_36 = arith.constant dense<0.000000e+00> : vector<2x1xf32>
    %88 = vector.multi_reduction <add>, %86, %cst_36 [2] : vector<2x1x1xf32> to vector<2x1xf32>
    %89 = vector.shape_cast %88 : vector<2x1xf32> to vector<2x1x1xf32>
    %90 = vector.broadcast %89 : vector<2x1x1xf32> to vector<2x1x128xf32>
    %91 = arith.divf %87, %90 : vector<2x1x128xf32>
    "tpu.trace_start"() <{level = 10 : i32, message = "bqd,bkd->bqk"}> : () -> ()
    %cst_37 = arith.constant dense<0.000000e+00> : vector<2x1x8xf32>
    %92 = tpu.matmul %39, %79, %cst_37 {dimension_numbers = #tpu.dot_dimension_numbers<[2], [2], [1], [1], [0, 0, 0, 1, 1, 1], [0], [0]>} : vector<2x1x128xf32>, vector<2x8x128xf32>, vector<2x1x8xf32> -> vector<2x1x8xf32>
    "tpu.trace_stop"() : () -> ()
    %cst_38 = arith.constant dense<0xFF800000> : vector<2x1xf32>
    %93 = vector.multi_reduction <maximumf>, %92, %cst_38 [2] : vector<2x1x8xf32> to vector<2x1xf32>
    %94 = vector.shape_cast %93 : vector<2x1xf32> to vector<2x1x1xf32>
    %95 = vector.broadcast %94 : vector<2x1x1xf32> to vector<2x1x8xf32>
    %96 = arith.subf %92, %95 : vector<2x1x8xf32>
    %97 = math.exp %96 : vector<2x1x8xf32>
    "tpu.trace_start"() <{level = 10 : i32, message = "bqk,bkd->bqd"}> : () -> ()
    %cst_39 = arith.constant dense<0.000000e+00> : vector<2x1x128xf32>
    %98 = tpu.matmul %97, %81, %cst_39 {dimension_numbers = #tpu.dot_dimension_numbers<[2], [1], [1], [2], [0, 0, 0, 1, 1, 2], [0], [0]>} : vector<2x1x8xf32>, vector<2x8x128xf32>, vector<2x1x128xf32> -> vector<2x1x128xf32>
    "tpu.trace_stop"() : () -> ()
    %cst_40 = arith.constant dense<0.000000e+00> : vector<2x1xf32>
    %99 = vector.multi_reduction <add>, %97, %cst_40 [2] : vector<2x1x8xf32> to vector<2x1xf32>
    %100 = vector.shape_cast %99 : vector<2x1xf32> to vector<2x1x1xf32>
    %101 = vector.broadcast %100 : vector<2x1x1xf32> to vector<2x1x128xf32>
    %102 = arith.divf %98, %101 : vector<2x1x128xf32>
    %103 = vector.shape_cast %91 : vector<2x1x128xf32> to vector<2x128xf32>
    %104 = vector.shape_cast %102 : vector<2x1x128xf32> to vector<2x128xf32>
    %105 = tpu.concatenate %103, %104 in 1 : vector<2x128xf32>, vector<2x128xf32> -> vector<2x256xf32>
    %106 = arith.truncf %105 : vector<2x256xf32> to vector<2x256xbf16>
    %c0_41 = arith.constant 0 : index
    %c128_42 = arith.constant 128 : index
    %107 = vector.load %arg4[%c0_41, %c128_42] : memref<256x256xbf16, #tpu.memory_space<vmem>>, vector<256x128xbf16>
    %cst_43 = arith.constant dense<0.000000e+00> : vector<2x128xf32>
    %108 = tpu.matmul %106, %107, %cst_43 {dimension_numbers = #tpu.dot_dimension_numbers<[1], [0], [0], [1], [0, 0, 1, 1], [], []>} : vector<2x256xbf16>, vector<256x128xbf16>, vector<2x128xf32> -> vector<2x128xf32>
    %c0_44 = arith.constant 0 : index
    %c128_45 = arith.constant 128 : index
    %109 = vector.load %arg6[%c0_44, %c128_45] : memref<1x256xf32, #tpu.memory_space<vmem>>, vector<1x128xf32>
    %110 = vector.broadcast %109 : vector<1x128xf32> to vector<2x128xf32>
    %111 = arith.addf %108, %110 : vector<2x128xf32>
    %112 = vector.shape_cast %111 : vector<2x128xf32> to vector<2x1x128xf32>
    %c0_46 = arith.constant 0 : index
    %c0_47 = arith.constant 0 : index
    %c0_48 = arith.constant 0 : index
    %113 = vector.load %arg7[%c0_46, %c0_47, %c0_48] : memref<2x1x128xf32, #tpu.memory_space<vmem>>, vector<2x1x128xf32>
    tpu.vector_store %arg7[%c0_46, %c0_47, %c0_48], %112 {strides = array<i32>} : memref<2x1x128xf32, #tpu.memory_space<vmem>>, vector<2x1x128xf32>,
    %c0_49 = arith.constant 0 : index
    %c0_50 = arith.constant 0 : index
    %c0_51 = arith.constant 0 : index
    %114 = vector.load %arg8[%c0_49, %c0_50, %c0_51] : memref<2x8x128xf32, #tpu.memory_space<vmem>>, vector<2x8x128xf32>
    tpu.vector_store %arg8[%c0_49, %c0_50, %c0_51], %70 {strides = array<i32>} : memref<2x8x128xf32, #tpu.memory_space<vmem>>, vector<2x8x128xf32>,
    return
  }
  func.func @transform_0(%arg0: i32) -> (i32, i32, i32) {
    %c0_i32 = arith.constant 0 : i32
    %c0_i32_0 = arith.constant 0 : i32
    %c0_i32_1 = arith.constant 0 : i32
    return %arg0, %c0_i32, %c0_i32_0 : i32, i32, i32
  }
  func.func @transform_1(%arg0: i32) -> (i32, i32, i32) {
    %c0_i32 = arith.constant 0 : i32
    %c0_i32_0 = arith.constant 0 : i32
    %c0_i32_1 = arith.constant 0 : i32
    return %arg0, %c0_i32, %c0_i32_0 : i32, i32, i32
  }
  func.func @transform_2(%arg0: i32) -> (i32, i32) {
    %c0_i32 = arith.constant 0 : i32
    %c0_i32_0 = arith.constant 0 : i32
    %c0_i32_1 = arith.constant 0 : i32
    return %c0_i32, %c0_i32_0 : i32, i32
  }
  func.func @transform_3(%arg0: i32) -> (i32, i32) {
    %c0_i32 = arith.constant 0 : i32
    %c0_i32_0 = arith.constant 0 : i32
    %c0_i32_1 = arith.constant 0 : i32
    return %c0_i32, %c0_i32_0 : i32, i32
  }
  func.func @transform_4(%arg0: i32) -> (i32, i32) {
    %c0_i32 = arith.constant 0 : i32
    %c0_i32_0 = arith.constant 0 : i32
    %c0_i32_1 = arith.constant 0 : i32
    return %c0_i32, %c0_i32_0 : i32, i32
  }
  func.func @transform_5(%arg0: i32) -> (i32, i32) {
    %c0_i32 = arith.constant 0 : i32
    %c0_i32_0 = arith.constant 0 : i32
    %c0_i32_1 = arith.constant 0 : i32
    return %c0_i32, %c0_i32_0 : i32, i32
  }
  func.func @transform_6(%arg0: i32) -> (i32, i32, i32) {
    %c0_i32 = arith.constant 0 : i32
    %c0_i32_0 = arith.constant 0 : i32
    %c0_i32_1 = arith.constant 0 : i32
    return %arg0, %c0_i32, %c0_i32_0 : i32, i32, i32
  }
  func.func @transform_7(%arg0: i32) -> (i32, i32, i32) {
    %c0_i32 = arith.constant 0 : i32
    %c0_i32_0 = arith.constant 0 : i32
    %c0_i32_1 = arith.constant 0 : i32
    return %arg0, %c0_i32, %c0_i32_0 : i32, i32, i32
  }
}

</mosaic_0001>

<bundles_post_ra>
// kernel: global_graph_forward.1
= control target key start
LH: loop header
LB: loop body
LE: loop exit
PB: predicated region body
PF: predicated region fallthrough
CT: control target
= control target key end

     0   :  { %13 = vsyncpa [#allocation3], 0  ;;  %v2938_v2 = vmov 0   ;;  %vm381_vm0 = vcmask 1041409   ;;  %s3535_s0 = inlined_call_operand.vmem [shape: f32[2,1,128], index: 0, kind: input, shape index: {}]   ;;  %s3536_s1 = inlined_call_operand.vmem [shape: f32[2,8,128], index: 1, kind: input, shape index: {}]   ;;  %s3537_s2 = inlined_call_operand.vmem [shape: bf16[128,1152], index: 2, kind: input, shape index: {}]   ;;  %s3538_s3 = inlined_call_operand.vmem [shape: bf16[256,256], index: 3, kind: input, shape index: {}]   ;;  %s3539_s4 = inlined_call_operand.vmem [shape: f32[1,1152], index: 4, kind: input, shape index: {}]   ;;  %s3540_s5 = inlined_call_operand.vmem [shape: f32[1,256], index: 5, kind: input, shape index: {}]   ;;  %s3541_s6 = inlined_call_operand.hbm [shape: f32[2,1,128], index: 6, kind: output, shape index: {0}]   ;;  %s3542_s7 = inlined_call_operand.hbm [shape: f32[2,8,128], index: 7, kind: output, shape index: {1}]  }
   0x1   :  { %v2713_v0 = vld [vmem:[%s3537_s2 + $0x1fc] ss:$36 sps:$4 sm:$0xff]   ;;  %242 = vmatprep.mubr.bf16.mxu0 %v2938_v2  ;;  %2712 = vset.pattern.permute.xlu1 %v2938_v2  ;;  %v2716_v3 = vld [vmem:[%s3537_s2 + $0x1b4] ss:$36 sps:$4 sm:$0xff]   ;;  %v2719_v5 = vld [vmem:[%s3537_s2 + $0x16c] ss:$36 sps:$4 sm:$0xff]  }
   0x2   :  { %v2715_v1 = vld [vmem:[%s3537_s2 + $0x1f8] ss:$36 sps:$4 sm:$0xff]   ;;  %210 = vmatprep.subr.bf16.mxu0 %v2713_v0  ;;  %2711 = vset.pattern.permute.xlu0 %v2938_v2  ;;  %v2718_v4 = vld [vmem:[%s3537_s2 + $0x1b0] ss:$36 sps:$4 sm:$0xff]   ;;  %v2721_v6 = vld [vmem:[%s3537_s2 + $0x168] ss:$36 sps:$4 sm:$0xff]  }
   0x3   :  { %211 = vmatpush1.bf16.msra.mxu0 %v2715_v1  ;;  %v2722_v7 = vld [vmem:[%s3537_s2 + $0x124] ss:$36 sps:$4 sm:$0xff]   ;;  %v2725_v9 = vld [vmem:[%s3537_s2 + $0xdc] ss:$36 sps:$4 sm:$0xff]   ;;  %v2728_v11 = vld [vmem:[%s3537_s2 + $0x94] ss:$36 sps:$4 sm:$0xff]  }
   0x4   :  { %212 = vmatprep.subr.bf16.mxu0 %v2716_v3  ;;  %v2724_v8 = vld [vmem:[%s3537_s2 + $0x120] ss:$36 sps:$4 sm:$0xff]   ;;  %v2727_v10 = vld [vmem:[%s3537_s2 + $0xd8] ss:$36 sps:$4 sm:$0xff]   ;;  %v2730_v12 = vld [vmem:[%s3537_s2 + $0x90] ss:$36 sps:$4 sm:$0xff]  }
   0x5   :  { %v2731_v13 = vld [vmem:[%s3537_s2 + $0x4c] ss:$36 sps:$4 sm:$0xff]   ;;  %v2734_v15 = vld [vmem:[%s3537_s2 + $0x4] ss:$36 sps:$4 sm:$0xff]   ;;  %v2737_v21 = vld [vmem:[%s3537_s2 + $0x1fc] ss:$36 sps:$4 sm:$0xff]  }
   0x6   :  { %v2733_v14 = vld [vmem:[%s3537_s2 + $0x48] ss:$36 sps:$4 sm:$0xff]   ;;  %v2736_v16 = vld [vmem:[%s3537_s2] ss:$36 sps:$4 sm:$0xff]   ;;  %v2742_v22 = vld [vmem:[%s3537_s2 + $0x1b8] ss:$36 sps:$4 sm:$0xff]  }
   0x7   :  { %213 = vmatpush1.bf16.msra.mxu0 %v2718_v4  ;;  %v3042_v17 = vld [vmem:[%s3536_s1] sm:$0xff]  ;;  %v31_v18 = vld [vmem:[%s3536_s1 + $0x8] sm:$0xff]  ;;  %v2740_v23 = vld [vmem:[%s3537_s2 + $0x1b4] ss:$36 sps:$4 sm:$0xff]  }
   0x8   :  { %214 = vmatprep.subr.bf16.mxu0 %v2719_v5  ;;  %v2739_v19 = vld [vmem:[%s3537_s2 + $0x200] ss:$36 sps:$4 sm:$0xff]   ;;  %v3051_v20 = vpack.c.bf16 %v31_v18, %v3042_v17  ;;  %v2745_v24 = vld [vmem:[%s3537_s2 + $0x170] ss:$36 sps:$4 sm:$0xff]   ;;  %v2748_v26 = vld [vmem:[%s3537_s2 + $0x128] ss:$36 sps:$4 sm:$0xff]  }
   0x9   :  { %v2743_v25 = vld [vmem:[%s3537_s2 + $0x16c] ss:$36 sps:$4 sm:$0xff]   ;;  %v2746_v27 = vld [vmem:[%s3537_s2 + $0x124] ss:$36 sps:$4 sm:$0xff]   ;;  %v29_v28 = vld [vmem:[%s3535_s0 + $0x1] sm:$0x1] }
   0xa   :  { %v2751_v29 = vld [vmem:[%s3537_s2 + $0xe0] ss:$36 sps:$4 sm:$0xff]   ;;  %v2754_v31 = vld [vmem:[%s3537_s2 + $0x98] ss:$36 sps:$4 sm:$0xff]   ;;  %v295_v33 = vpack.c.bf16 %v29_v28, %v29_v28  ;;  %v2757_v35 = vld [vmem:[%s3537_s2 + $0x50] ss:$36 sps:$4 sm:$0xff]  }
   0xb   :  { %215 = vmatpush1.bf16.msra.mxu0 %v2721_v6  ;;  %v2749_v30 = vld [vmem:[%s3537_s2 + $0xdc] ss:$36 sps:$4 sm:$0xff]   ;;  %v2752_v34 = vld [vmem:[%s3537_s2 + $0x94] ss:$36 sps:$4 sm:$0xff]   ;;  %v2755_v38 = vld [vmem:[%s3537_s2 + $0x4c] ss:$36 sps:$4 sm:$0xff]  }
   0xc   :  { %216 = vmatprep.subr.bf16.mxu0 %v2722_v7  ;;  %v28_v32 = vld [vmem:[%s3535_s0] sm:$0x1]  ;;  %v379_v36 = vunpack.c.l.b16 %v295_v33  ;;  %v2760_v39 = vld [vmem:[%s3537_s2 + $0x8] ss:$36 sps:$4 sm:$0xff]   ;;  %v2763_v43 = vld [vmem:[%s3537_s2 + $0x210] ss:$36 sps:$4 sm:$0xff]  }
   0xd   :  { %v294_v37 = vpack.c.bf16 %v28_v32, %v28_v32  ;;  %v2758_v42 = vld [vmem:[%s3537_s2 + $0x4] ss:$36 sps:$4 sm:$0xff]   ;;  %v2761_v45 = vld [vmem:[%s3537_s2 + $0x20c] ss:$36 sps:$4 sm:$0xff]  }
   0xe   :  { %v380_v40 = vrot.slane %v379_v36, 7  ;;  %v2766_v47 = vld [vmem:[%s3537_s2 + $0x1c8] ss:$36 sps:$4 sm:$0xff]  }
   0xf   :  { %217 = vmatpush1.bf16.msra.mxu0 %v2724_v8  ;;  %v378_v41 = vunpack.c.l.b16 %v294_v37 }
  0x10   :  { %218 = vmatprep.subr.bf16.mxu0 %v2725_v9 }
  0x11   :  { %v382_v44 = vsel %vm381_vm0, %v380_v40, %v378_v41 }
  0x12   :  { %v3113_v46 = vpack.c.b16 %v382_v44, %v382_v44 }
  0x13   :  { %219 = vmatpush1.bf16.msra.mxu0 %v2727_v10 }
  0x14   :  { %220 = vmatprep.subr.bf16.mxu0 %v2728_v11 }
  0x17   :  { %221 = vmatpush1.bf16.msra.mxu0 %v2730_v12 }
  0x18   :  { %222 = vmatprep.subr.bf16.mxu0 %v2731_v13 }
  0x1b   :  { %223 = vmatpush1.bf16.msra.mxu0 %v2733_v14 }
  0x1c   :  { %224 = vmatprep.subr.bf16.mxu0 %v2734_v15 }
  0x1f   :  { %225 = vmatpush1.bf16.msra.mxu0 %v2736_v16 }
  0x20   :  { %625 = vmatprep.subr.bf16.mxu0 %v2739_v19 }
  0x22   :  { %243 = vmatmul.mubr.bf16.vlgmr.msra.gmra.mxu0 %v3051_v20 }
  0x23   :  { %626 = vmatpush1.bf16.msra.mxu0 %v2737_v21  ;;  %657 = vmatprep.mubr.bf16.mxu0 %v2938_v2 }
  0x24   :  { %627 = vmatprep.subr.bf16.mxu0 %v2742_v22 }
  0x27   :  { %628 = vmatpush1.bf16.msra.mxu0 %v2740_v23 }
  0x28   :  { %629 = vmatprep.subr.bf16.mxu0 %v2745_v24 }
  0x2b   :  { %630 = vmatpush1.bf16.msra.mxu0 %v2743_v25 }
  0x2c   :  { %631 = vmatprep.subr.bf16.mxu0 %v2748_v26 }
  0x2f   :  { %632 = vmatpush1.bf16.msra.mxu0 %v2746_v27 }
  0x30   :  { %633 = vmatprep.subr.bf16.mxu0 %v2751_v29 }
  0x33   :  { %634 = vmatpush1.bf16.msra.mxu0 %v2749_v30 }
  0x34   :  { %635 = vmatprep.subr.bf16.mxu0 %v2754_v31 }
  0x37   :  { %636 = vmatpush1.bf16.msra.mxu0 %v2752_v34 }
  0x38   :  { %637 = vmatprep.subr.bf16.mxu0 %v2757_v35 }
  0x3b   :  { %638 = vmatpush1.bf16.msra.mxu0 %v2755_v38 }
  0x3c   :  { %639 = vmatprep.subr.bf16.mxu0 %v2760_v39 }
  0x3f   :  { %640 = vmatpush1.bf16.msra.mxu0 %v2758_v42 }
  0x40   :  { %707 = vmatprep.subr.bf16.mxu0 %v2763_v43 }
  0x41   :  { %14 = vsyncpa [#allocation5], 0  ;;  %v2764_v48 = vld [vmem:[%s3537_s2 + $0x1c4] ss:$36 sps:$4 sm:$0xff]   ;;  %v2767_v50 = vld [vmem:[%s3537_s2 + $0x17c] ss:$36 sps:$4 sm:$0xff]   ;;  %v67_v62 = vlaneseq }
  0x42   :  { %658 = vmatmul.mubr.bf16.vlgmr.msra.gmra.mxu0 %v3113_v46  ;;  %v2769_v49 = vld [vmem:[%s3537_s2 + $0x180] ss:$36 sps:$4 sm:$0xff]   ;;  %v2772_v51 = vld [vmem:[%s3537_s2 + $0x138] ss:$36 sps:$4 sm:$0xff]   ;;  %v2775_v53 = vld [vmem:[%s3537_s2 + $0xf0] ss:$36 sps:$4 sm:$0xff]  }
  0x43   :  { %708 = vmatpush1.bf16.msra.mxu0 %v2761_v45  ;;  %739 = vmatprep.mubr.bf16.mxu0 %v2938_v2  ;;  %v2770_v52 = vld [vmem:[%s3537_s2 + $0x134] ss:$36 sps:$4 sm:$0xff]   ;;  %v2773_v54 = vld [vmem:[%s3537_s2 + $0xec] ss:$36 sps:$4 sm:$0xff]   ;;  %v2776_v56 = vld [vmem:[%s3537_s2 + $0xa4] ss:$36 sps:$4 sm:$0xff]  }
  0x44   :  { %709 = vmatprep.subr.bf16.mxu0 %v2766_v47  ;;  %v2778_v55 = vld [vmem:[%s3537_s2 + $0xa8] ss:$36 sps:$4 sm:$0xff]   ;;  %v2781_v57 = vld [vmem:[%s3537_s2 + $0x60] ss:$36 sps:$4 sm:$0xff]   ;;  %v2784_v59 = vld [vmem:[%s3537_s2 + $0x18] ss:$36 sps:$4 sm:$0xff]  }
  0x45   :  { %v2779_v58 = vld [vmem:[%s3537_s2 + $0x5c] ss:$36 sps:$4 sm:$0xff]   ;;  %v2782_v60 = vld [vmem:[%s3537_s2 + $0x14] ss:$36 sps:$4 sm:$0xff]   ;;  %v2939_v61 = vmov 0.0   ;;  %vm2940_vm1 = vmmov 0  }
  0x46   :  { %2601 = vmatprep.subr.bf16.mxu1 %v2939_v61  ;;  %2617 = vmatprep.mubr.msk.bf16.mxu1 %vm2940_vm1, %v2939_v61  ;;  %v3166_v63 = vshrl.u32 %v67_v62, 7  ;;  %v3174_v1 = vld [vmem:[%s3539_s4] sm:$0x7]  ;;  %v2941_v16 = vmov 1966171168   ;;  %vm1052_vm2 = vcmask 64512  }
  0x47   :  { %710 = vmatpush1.bf16.msra.mxu0 %v2764_v48  ;;  %v752_v18 = vunpack.c.l.s4 %v2941_v16  ;;  %v3192_v19 = vld [vmem:[%s3539_s4 + $0x1] sm:$0x3f]  ;;  %v2786_v42 = vld [vmem:[%s3537_s2 + $0x1b8] ss:$36 sps:$4 sm:$0xff]   ;;  %v2787_v43 = vld [vmem:[%s3537_s2 + $0x170] ss:$36 sps:$4 sm:$0xff]  }
  0x48   :  { %711 = vmatprep.subr.bf16.mxu0 %v2769_v49  ;;  %v3169_v0 = vsub.s32 0, %v3166_v63  ;;  %v3177_v3 = vsub.s32 1, %v3166_v63  ;;  %v2785_v41 = vld [vmem:[%s3537_s2 + $0x200] ss:$36 sps:$4 sm:$0xff]   ;;  %v2788_v44 = vld [vmem:[%s3537_s2 + $0x128] ss:$36 sps:$4 sm:$0xff]  }
  0x49   :  { %v753_v21 = vunpack.c.0.s8 %v752_v18  ;;  %2602 = vmatpush3.bf16.msra.mxu1 %v2785_v41  ;;  %v2789_v45 = vld [vmem:[%s3537_s2 + $0xe0] ss:$36 sps:$4 sm:$0xff]   ;;  %v2790_v47 = vld [vmem:[%s3537_s2 + $0x98] ss:$36 sps:$4 sm:$0xff]   ;;  %v2791_v48 = vld [vmem:[%s3537_s2 + $0x50] ss:$36 sps:$4 sm:$0xff]  }
  0x4a   :  { %v70_v4 = vrot.slane %v3174_v1, %v3169_v0  ;;  %v74_v5 = vrot.slane %v3174_v1, %v3177_v3  ;;  %v349_v22 = vrot.slane %v3192_v19, %v3169_v0  ;;  %2603 = vmatprep.subr.bf16.mxu1 %v2939_v61  ;;  %v2792_v49 = vld [vmem:[%s3537_s2 + $0x8] ss:$36 sps:$4 sm:$0xff]   ;;  %v2813_v62 = vld [vmem:[%s3537_s2 + $0x58] ss:$36 sps:$4 sm:$0xff]   ;;  %vm1243_vm3 = vcmask 1040384  }
  0x4b   :  { %712 = vmatpush1.bf16.msra.mxu0 %v2767_v50  ;;  %v3197_v23 = vsub.s32 %v753_v21, %v3166_v63  ;;  %v2795_v50 = vld [vmem:[%s3537_s2 + $0x208] ss:$36 sps:$4 sm:$0xff]   ;;  %vm1239_vm4 = vcmask 7168   ;;  %vm1992_vm5 = vcmask 57344  }
  0x4c   :  { %713 = vmatprep.subr.bf16.mxu0 %v2772_v51  ;;  %v2793_v51 = vld [vmem:[%s3537_s2 + $0x204] ss:$36 sps:$4 sm:$0xff]  }
  0x4d   :  { %2604 = vmatpush3.bf16.msra.mxu1 %v2786_v42 }
  0x4e   :  { %2605 = vmatprep.subr.bf16.mxu1 %v2939_v61 }
  0x4f   :  { %714 = vmatpush1.bf16.msra.mxu0 %v2770_v52  ;;  %v2798_v52 = vld [vmem:[%s3537_s2 + $0x1c0] ss:$36 sps:$4 sm:$0xff]  }
  0x50   :  { %715 = vmatprep.subr.bf16.mxu0 %v2775_v53  ;;  %v2796_v53 = vld [vmem:[%s3537_s2 + $0x1bc] ss:$36 sps:$4 sm:$0xff]  }
  0x51   :  { %2606 = vmatpush3.bf16.msra.mxu1 %v2787_v43 }
  0x52   :  { %2607 = vmatprep.subr.bf16.mxu1 %v2939_v61 }
  0x53   :  { %716 = vmatpush1.bf16.msra.mxu0 %v2773_v54  ;;  %v2801_v54 = vld [vmem:[%s3537_s2 + $0x178] ss:$36 sps:$4 sm:$0xff]  }
  0x54   :  { %717 = vmatprep.subr.bf16.mxu0 %v2778_v55  ;;  %v2799_v55 = vld [vmem:[%s3537_s2 + $0x174] ss:$36 sps:$4 sm:$0xff]  }
  0x55   :  { %2608 = vmatpush3.bf16.msra.mxu1 %v2788_v44 }
  0x56   :  { %2609 = vmatprep.subr.bf16.mxu1 %v2939_v61 }
  0x57   :  { %718 = vmatpush1.bf16.msra.mxu0 %v2776_v56  ;;  %v2802_v56 = vld [vmem:[%s3537_s2 + $0x12c] ss:$36 sps:$4 sm:$0xff]  }
  0x58   :  { %719 = vmatprep.subr.bf16.mxu0 %v2781_v57  ;;  %v2807_v57 = vld [vmem:[%s3537_s2 + $0xe8] ss:$36 sps:$4 sm:$0xff]  }
  0x59   :  { %2610 = vmatpush3.bf16.msra.mxu1 %v2789_v45 }
  0x5a   :  { %2611 = vmatprep.subr.bf16.mxu1 %v2939_v61 }
  0x5b   :  { %720 = vmatpush1.bf16.msra.mxu0 %v2779_v58  ;;  %v2805_v58 = vld [vmem:[%s3537_s2 + $0xe4] ss:$36 sps:$4 sm:$0xff]  }
  0x5c   :  { %721 = vmatprep.subr.bf16.mxu0 %v2784_v59  ;;  %v2810_v59 = vld [vmem:[%s3537_s2 + $0xa0] ss:$36 sps:$4 sm:$0xff]  }
  0x5d   :  { %2612 = vmatpush3.bf16.msra.mxu1 %v2790_v47 }
  0x5e   :  { %2613 = vmatprep.subr.bf16.mxu1 %v2939_v61 }
  0x5f   :  { %722 = vmatpush1.bf16.msra.mxu0 %v2782_v60  ;;  %v2808_v60 = vld [vmem:[%s3537_s2 + $0x9c] ss:$36 sps:$4 sm:$0xff]  }
  0x60   :  { %2621 = vmatprep.subr.mxu0 %v2939_v61 }
  0x61   :  { %2614 = vmatpush3.bf16.msra.mxu1 %v2791_v48 }
  0x62   :  { %740 = vmatmul.mubr.bf16.vlgmr.msra.gmra.mxu0 %v3113_v46  ;;  %2615 = vmatprep.subr.bf16.mxu1 %v2939_v61 }
  0x63   :  { %2623 = vmatprep.mubr.msk.f32.mxu0 %vm2940_vm1, %v2939_v61 }
  0x65   :  { %2616 = vmatpush3.bf16.msra.mxu1 %v2792_v49 }
  0x66   :  { %666 = vmatprep.subr.bf16.mxu1 %v2795_v50 }
  0x68   :  { %2618 = vmatmul.mubr.bf16.vlgmr.msra.gmra.mxu1 %v3051_v20  ;;  %v2804_v20 = vld [vmem:[%s3537_s2 + $0x130] ss:$36 sps:$4 sm:$0xff]  }
  0x69   :  { %667 = vmatpush1.bf16.msra.mxu1 %v2793_v51  ;;  %698 = vmatprep.mubr.bf16.mxu1 %v2938_v2 }
  0x6a   :  { %668 = vmatprep.subr.bf16.mxu1 %v2798_v52 }
  0x6d   :  { %669 = vmatpush1.bf16.msra.mxu1 %v2796_v53 }
  0x6e   :  { %670 = vmatprep.subr.bf16.mxu1 %v2801_v54 }
  0x71   :  { %671 = vmatpush1.bf16.msra.mxu1 %v2799_v55 }
  0x72   :  { %672 = vmatprep.subr.bf16.mxu1 %v2804_v20 }
  0x75   :  { %673 = vmatpush1.bf16.msra.mxu1 %v2802_v56  ;;  %v353_v56 = vrot.slane %v3192_v19, %v3177_v3 }
  0x76   :  { %674 = vmatprep.subr.bf16.mxu1 %v2807_v57 }
  0x79   :  { %675 = vmatpush1.bf16.msra.mxu1 %v2805_v58 }
  0x7a   :  { %676 = vmatprep.subr.bf16.mxu1 %v2810_v59 }
  0x7d   :  { %677 = vmatpush1.bf16.msra.mxu1 %v2808_v60 }
  0x7e   :  { %678 = vmatprep.subr.bf16.mxu1 %v2813_v62 }
  0xe2   :  { %v244_v6 = vpop.f32.mrf.mxu0 }
  0xe3   :  { %v245_v7 = vadd.f32 %v244_v6, %v70_v4  ;;  %v2814_v6 = vld [vmem:[%s3537_s2 + $0xc] ss:$36 sps:$4 sm:$0xff]  }
  0xe4   :  { %v246_v8 = vpop.f32.mrf.mxu0 }
  0xe5   :  { %v247_v9 = vadd.f32 %v246_v8, %v74_v5  ;;  %v748_v11 = vmul.f32 0.17677669, %v245_v7 }
  0xe6   :  { %v248_v10 = vpop.f32.mrf.mxu0 }
  0xe7   :  { %2622 = vmatpush3.xpose.msra.mxu0 %v247_v9  ;;  %v249_v12 = vadd.f32 %v248_v10, %v70_v4  ;;  %v2811_v4 = vld [vmem:[%s3537_s2 + $0x54] ss:$36 sps:$4 sm:$0xff]  }
  0xe8   :  { %v250_v13 = vpop.f32.mrf.mxu0  ;;  %2626 = vmatprep.subr.mxu0 %v2939_v61  ;;  %679 = vmatpush1.bf16.msra.mxu1 %v2811_v4 }
  0xe9   :  { %v251_v14 = vadd.f32 %v250_v13, %v74_v5  ;;  %v749_v15 = vmul.f32 0.17677669, %v249_v12  ;;  %v2816_v5 = vld [vmem:[%s3537_s2 + $0x10] ss:$36 sps:$4 sm:$0xff]  }
  0xea   :  { %2624 = vmatmul.mubr.f32.vlgmr.msra.gmra.mxu0 %v748_v11  ;;  %680 = vmatprep.subr.bf16.mxu1 %v2816_v5 }
  0xeb   :  { %2627 = vmatpush3.xpose.msra.mxu0 %v251_v14  ;;  %2628 = vmatprep.mubr.msk.f32.mxu0 %vm2940_vm1, %v2939_v61 }
  0xec   :  { %2631 = vmatprep.subr.mxu0 %v2939_v61  ;;  %681 = vmatpush1.bf16.msra.mxu1 %v2814_v6 }
  0xed   :  { %2636 = vmatprep.subr.mxu1 %v2939_v61 }
  0xee   :  { %2629 = vmatmul.mubr.f32.vlgmr.msra.gmra.mxu0 %v749_v15 }
  0xef   :  { %2633 = vmatprep.mubr.msk.f32.mxu0 %vm2940_vm1, %v2939_v61  ;;  %699 = vmatmul.mubr.bf16.vlgmr.msra.gmra.mxu1 %v3113_v46 }
  0xf0   :  { %2638 = vmatprep.mubr.msk.f32.mxu1 %vm2940_vm1, %v2939_v61 }
 0x102   :  { %v659_v24 = vpop.f32.mrf.mxu0 }
 0x103   :  { %v660_v25 = vadd.f32 %v659_v24, %v349_v22  ;;  %v77_v24 = vsub.s32 2, %v3166_v63 }
 0x104   :  { %v3199_v26 = vpop.f32.mrf.mxu0 }
 0x105   :  { %v757_v27 = vrot.slane %v660_v25, %v3197_v23  ;;  %v662_v58 = vadd.f32 %v3199_v26, %v353_v56  ;;  %v2837_v56 = vld [vmem:[%s3537_s2 + $0xf4] ss:$36 sps:$4 sm:$0xff]  }
 0x106   :  { %v663_v28 = vpop.f32.mrf.mxu0 }
 0x107   :  { %v758_v29 = vcombine.high %v757_v27, %v757_v27  ;;  %v765_v30 = vrot.slane %v757_v27, %v3197_v23  ;;  %v78_v27 = vrot.slane %v3174_v1, %v77_v24  ;;  %v780_v60 = vrot.slane %v662_v58, %v3197_v23  ;;  %v2840_v58 = vld [vmem:[%s3537_s2 + $0xac] ss:$36 sps:$4 sm:$0xff]  }
 0x108   :  { %v664_v31 = vpop.f32.mrf.mxu0 }
 0x109   :  { %v899_v32 = vrot.slane %v765_v30, %v3169_v0  ;;  %v772_v33 = vrot.slane %v758_v29, %v3197_v23  ;;  %v781_v5 = vcombine.high %v780_v60, %v780_v60  ;;  %v788_v6 = vrot.slane %v780_v60, %v3197_v23 }
 0x10b   :  { %v901_v34 = vmul.f32 %v899_v32, %v748_v11  ;;  %v907_v35 = vrot.slane %v772_v33, %v3169_v0  ;;  %v357_v33 = vrot.slane %v3192_v19, %v77_v24  ;;  %v2821_v24 = vld [vmem:[%s3538_s3 + $0x30] ss:$8 sps:$4 sm:$0xff]  }
 0x10d   :  { %902 = vadd.xlane.f32.xlu1 %v901_v34  ;;  %v909_v36 = vmul.f32 %v907_v35, %v749_v15  ;;  %v360_v35 = vsub.s32 3, %v3166_v63 }
 0x10f   :  { %910 = vadd.xlane.f32.xlu0 %v909_v36 }
 0x122   :  { %v3206_v37 = vpop.f32.mrf.mxu0 }
 0x124   :  { %v3208_v38 = vpop.f32.mrf.mxu0 }
 0x126   :  { %v745_v39 = vpop.f32.mrf.mxu0 }
 0x127   :  { %v361_v39 = vrot.slane %v3192_v19, %v360_v35 }
 0x128   :  { %v746_v40 = vpop.f32.mrf.mxu0  ;;  %v287_v25 = vpop.f32.mrf.mxu1 }
 0x129   :  { %v288_v29 = vadd.f32 %v287_v25, %v78_v27 }
 0x12a   :  { %v2619_v28 = vpop.f32.mrf.mxu1 }
 0x12b   :  { %2632 = vmatpush3.msra.mxu0 %v288_v29  ;;  %v2822_v28 = vld [vmem:[%s3538_s3 + $0x20] ss:$8 sps:$4 sm:$0xff]   ;;  %v2823_v29 = vld [vmem:[%s3538_s3 + $0x10] ss:$8 sps:$4 sm:$0xff]  }
 0x12c   :  { %v290_v30 = vpop.f32.mrf.mxu1 }
 0x12d   :  { %v291_v31 = vadd.f32 %v290_v30, %v78_v27  ;;  %v2824_v30 = vld [vmem:[%s3538_s3] ss:$8 sps:$4 sm:$0xff]  }
 0x12e   :  { %v2620_v32 = vpop.f32.mrf.mxu1 }
 0x12f   :  { %2637 = vmatpush3.msra.mxu1 %v291_v31 }
 0x130   :  { %2641 = vmatprep.subr.mxu1 %v2939_v61 }
 0x196   :  { %v903_v13 = vpop.xlane.xlu1 %902 }
 0x198   :  { %v911_v14 = vpop.xlane.xlu0 %910 }
 0x1aa   :  { %v978_v7 = vpop.f32.mrf.mxu0 }
 0x1ab   :  { %v1053_v8 = vsel %vm1052_vm2, %v978_v7, -inf }
 0x1ac   :  { %v2625_v9 = vpop.f32.mrf.mxu0  ;;  %1054 = vmax.xlane.f32.xlu1 %v1053_v8 }
 0x1ae   :  { %v1048_v10 = vpop.f32.mrf.mxu0 }
 0x1af   :  { %v1056_v11 = vsel %vm1052_vm2, %v1048_v10, -inf  ;;  %v700_v34 = vpop.f32.mrf.mxu1 }
 0x1b0   :  { %v2630_v12 = vpop.f32.mrf.mxu0  ;;  %1057 = vmax.xlane.f32.xlu0 %v1056_v11  ;;  %v701_v36 = vadd.f32 %v700_v34, %v357_v33 }
 0x1b1   :  { %v702_v40 = vpop.f32.mrf.mxu1 }
 0x1b2   :  { %v796_v41 = vmul.f32 0.17677669, %v701_v36  ;;  %v703_v1 = vadd.f32 %v702_v40, %v361_v39 }
 0x1b3   :  { %v704_v42 = vpop.f32.mrf.mxu1 }
 0x1b4   :  { %v804_v43 = vrot.slane %v796_v41, %v3197_v23  ;;  %v829_v44 = vrot.slane %v703_v1, %v3197_v23  ;;  %v2825_v41 = vld [vmem:[%s3537_s2 + $0x214] ss:$36 sps:$4 sm:$0xff]  }
 0x1b5   :  { %v705_v45 = vpop.f32.mrf.mxu1  ;;  %v2827_v1 = vld [vmem:[%s3537_s2 + $0x218] ss:$36 sps:$4 sm:$0xff]   ;;  %v2830_v42 = vld [vmem:[%s3537_s2 + $0x1d0] ss:$36 sps:$4 sm:$0xff]  }
 0x1b6   :  { %v812_v47 = vrot.slane %v804_v43, %v3197_v23  ;;  %v837_v48 = vrot.slane %v829_v44, %v3197_v23  ;;  %v830_v11 = vcombine.high %v829_v44, %v829_v44  ;;  %1629 = vmatprep.subr.bf16.mxu0 %v2827_v1  ;;  %v2828_v44 = vld [vmem:[%s3537_s2 + $0x1cc] ss:$36 sps:$4 sm:$0xff]  }
 0x1b8   :  { %v1672_v49 = vmul.f32 %v837_v48, %v812_v47  ;;  %v2833_v47 = vld [vmem:[%s3537_s2 + $0x188] ss:$36 sps:$4 sm:$0xff]  }
 0x1ba   :  { %v1673_v8 = vsel %vm1243_vm3, %v1672_v49, 0.0 }
 0x235   :  { %v1055_v15 = vpop.xlane.xlu1 %1054 }
 0x236   :  { %v1059_v16 = vmax.f32 %v903_v13, %v1055_v15  ;;  %v2817_v15 = vld [vmem:[%s3538_s3 + $0x70] ss:$8 sps:$4 sm:$0xff]  }
 0x238   :  { %v1061_v18 = vsub.f32 %v903_v13, %v1059_v16  ;;  %1069 = vperm.xlu1 %2712, %v1059_v16   ;;  %v844_v13 = vrot.slane %v830_v11, %v3197_v23  ;;  %v2818_v16 = vld [vmem:[%s3538_s3 + $0x60] ss:$8 sps:$4 sm:$0xff]  }
 0x239   :  { %v1058_v46 = vpop.xlane.xlu0 %1057  ;;  %v2843_v11 = vld [vmem:[%s3537_s2 + $0x64] ss:$36 sps:$4 sm:$0xff]  }
 0x23a   :  { %v1060_v21 = vmax.f32 %v911_v14, %v1058_v46  ;;  %v1063_v20 = vmul.f32 1.442695, %v1061_v18  ;;  %v2819_v18 = vld [vmem:[%s3538_s3 + $0x50] ss:$8 sps:$4 sm:$0xff]   ;;  %v2820_v46 = vld [vmem:[%s3538_s3 + $0x40] ss:$8 sps:$4 sm:$0xff]  }
 0x23c   :  { %v1062_v22 = vsub.f32 %v911_v14, %v1060_v21  ;;  %1074 = vperm.xlu0 %2711, %v1060_v21  }
 0x23e   :  { %v1065_v57 = vmul.f32 1.442695, %v1062_v22 }
 0x2b3   :  { %v1070_v50 = vpop.permute.xlu1 %1069 }
 0x2b4   :  { %v1077_v51 = vsub.f32 %v978_v7, %v1070_v50  ;;  %v2831_v50 = vld [vmem:[%s3537_s2 + $0x184] ss:$36 sps:$4 sm:$0xff]  }
 0x2b6   :  { %v1079_v52 = vmul.f32 1.442695, %v1077_v51 }
 0x2b7   :  { %v1075_v53 = vpop.permute.xlu0 %1074 }
 0x2b8   :  { %2865 = vpow2.f32 %v1079_v52  ;;  %v1078_v54 = vsub.f32 %v1048_v10, %v1075_v53  ;;  %v805_v10 = vcombine.high %v804_v43, %v804_v43  ;;  %v2836_v52 = vld [vmem:[%s3537_s2 + $0x140] ss:$36 sps:$4 sm:$0xff]  }
 0x2ba   :  { %v1081_v55 = vmul.f32 1.442695, %v1078_v54  ;;  %v819_v12 = vrot.slane %v805_v10, %v3197_v23 }
 0x2bc   :  { %2867 = vpow2.f32 %v1081_v55  ;;  %v1676_v14 = vmul.f32 %v844_v13, %v819_v12  ;;  %v2834_v55 = vld [vmem:[%s3537_s2 + $0x13c] ss:$36 sps:$4 sm:$0xff]  }
 0x2bd   :  { %2869 = vpow2.f32 %v1063_v20  ;;  %v2839_v20 = vld [vmem:[%s3537_s2 + $0xf8] ss:$36 sps:$4 sm:$0xff]   ;;  %v2848_v12 = vld [vmem:[%s3537_s2 + $0x20] ss:$36 sps:$4 sm:$0xff]  }
 0x2be   :  { %2871 = vpow2.f32 %v1065_v57  ;;  %v1677_v34 = vsel %vm1243_vm3, %v1676_v14, 0.0  ;;  %v2842_v57 = vld [vmem:[%s3537_s2 + $0xb0] ss:$36 sps:$4 sm:$0xff]   ;;  %v2846_v13 = vld [vmem:[%s3537_s2 + $0x1c] ss:$36 sps:$4 sm:$0xff]  }
 0x2c5   :  { %v2866_v59 = vpop.eup %2865 }
 0x2c6   :  { %2634 = vmatmul.mubr.msk.f32.vlgmr.msra.gmra.mxu0 %vm1052_vm2, %v2866_v59  ;;  %v1085_v62 = vsel %vm1052_vm2, %v2866_v59, 0.0 }
 0x2c7   :  { %1086 = vadd.xlane.f32.xlu1 %v1085_v62  ;;  %1661 = vmatprep.mubr.bf16.mxu0 %v2938_v2  ;;  %v795_v2 = vrot.slane %v781_v5, %v3197_v23  ;;  %v364_v62 = vsub.s32 4, %v3166_v63 }
 0x2c8   :  { %1630 = vmatpush1.bf16.msra.mxu0 %v2825_v41  ;;  %v1537_v41 = vld [vmem:[%s3539_s4 + $0x7] sm:$0x3] }
 0x2c9   :  { %v2868_v4 = vpop.eup %2867  ;;  %1631 = vmatprep.subr.bf16.mxu0 %v2830_v42  ;;  %v1542_v42 = vrot.slane %v1537_v41, %v3169_v0 }
 0x2ca   :  { %2639 = vmatmul.mubr.msk.f32.vlgmr.msra.gmra.mxu1 %vm1052_vm2, %v2868_v4  ;;  %v1088_v26 = vsel %vm1052_vm2, %v2868_v4, 0.0  ;;  %v2870_v7 = vpop.eup %2869  ;;  %v365_v4 = vrot.slane %v3192_v19, %v364_v62 }
 0x2cb   :  { %2642 = vmatpush3.msk.msra.mxu1 %vm1243_vm3, %v788_v6  ;;  %1089 = vadd.xlane.f32.xlu0 %v1088_v26  ;;  %v2872_v9 = vpop.eup %2871 }
 0x2cc   :  { %2643 = vmatprep.mubr.msk.f32.mxu1 %vm2940_vm1, %v2939_v61  ;;  %2646 = vmatprep.subr.mxu1 %v2939_v61  ;;  %v742_v5 = vadd.f32 %v3206_v37, %v365_v4  ;;  %v2845_v37 = vld [vmem:[%s3537_s2 + $0x68] ss:$36 sps:$4 sm:$0xff]  }
 0x2cd   :  { %1632 = vmatpush1.bf16.msra.mxu0 %v2828_v44 }
 0x2ce   :  { %2644 = vmatmul.mubr.msk.f32.vlgmr.msra.gmra.mxu1 %vm1239_vm4, %v2870_v7  ;;  %1633 = vmatprep.subr.bf16.mxu0 %v2833_v47  ;;  %v1546_v47 = vrot.slane %v1537_v41, %v3177_v3 }
 0x2cf   :  { %2647 = vmatpush3.msk.msra.mxu1 %vm1243_vm3, %v795_v2  ;;  %2648 = vmatprep.mubr.msk.f32.mxu1 %vm2940_vm1, %v2939_v61 }
 0x2d0   :  { %1674 = vadd.xlane.f32.xlu0 %v1673_v8  ;;  %2651 = vmatprep.subr.bf16.mxu1 %v2939_v61 }
 0x2d1   :  { %1634 = vmatpush1.bf16.msra.mxu0 %v2831_v50 }
 0x2d2   :  { %2649 = vmatmul.mubr.msk.f32.vlgmr.msra.gmra.mxu1 %vm1239_vm4, %v2872_v9  ;;  %1635 = vmatprep.subr.bf16.mxu0 %v2836_v52 }
 0x2d3   :  { %2667 = vmatprep.mubr.msk.bf16.mxu1 %vm2940_vm1, %v2939_v61  ;;  %2652 = vmatpush3.bf16.msra.mxu1 %v2817_v15 }
 0x2d4   :  { %2653 = vmatprep.subr.bf16.mxu1 %v2939_v61 }
 0x2d5   :  { %1636 = vmatpush1.bf16.msra.mxu0 %v2834_v55 }
 0x2d6   :  { %1637 = vmatprep.subr.bf16.mxu0 %v2839_v20 }
 0x2d7   :  { %2654 = vmatpush3.bf16.msra.mxu1 %v2818_v16  ;;  %v2487_v16 = vld [vmem:[%s3540_s5] ss:$0 sm:$0xff] }
 0x2d8   :  { %2655 = vmatprep.subr.bf16.mxu1 %v2939_v61 }
 0x2d9   :  { %1638 = vmatpush1.bf16.msra.mxu0 %v2837_v56 }
 0x2da   :  { %1639 = vmatprep.subr.bf16.mxu0 %v2842_v57 }
 0x2db   :  { %2656 = vmatpush3.bf16.msra.mxu1 %v2819_v18 }
 0x2dc   :  { %2657 = vmatprep.subr.bf16.mxu1 %v2939_v61 }
 0x2dd   :  { %1640 = vmatpush1.bf16.msra.mxu0 %v2840_v58 }
 0x2de   :  { %1641 = vmatprep.subr.bf16.mxu0 %v2845_v37  ;;  %v2852_v37 = vld [vmem:[%s3538_s3 + $0x64] ss:$8 sps:$4 sm:$0xff]  }
 0x2df   :  { %2658 = vmatpush3.bf16.msra.mxu1 %v2820_v46 }
 0x2e0   :  { %2659 = vmatprep.subr.bf16.mxu1 %v2939_v61 }
 0x2e1   :  { %1642 = vmatpush1.bf16.msra.mxu0 %v2843_v11  ;;  %v2853_v11 = vld [vmem:[%s3538_s3 + $0xd4] ss:$8 sps:$4 sm:$0xff]  }
 0x2e2   :  { %1643 = vmatprep.subr.bf16.mxu0 %v2848_v12  ;;  %v2854_v12 = vld [vmem:[%s3538_s3 + $0x54] ss:$8 sps:$4 sm:$0xff]  }
 0x2e3   :  { %2660 = vmatpush3.bf16.msra.mxu1 %v2821_v24 }
 0x2e4   :  { %2661 = vmatprep.subr.bf16.mxu1 %v2939_v61 }
 0x2e5   :  { %1644 = vmatpush1.bf16.msra.mxu0 %v2846_v13  ;;  %v2855_v13 = vld [vmem:[%s3538_s3 + $0xc4] ss:$8 sps:$4 sm:$0xff]  }
 0x2e6   :  { %2676 = vmatprep.subr.mxu0 %v2939_v61 }
 0x2e7   :  { %2662 = vmatpush3.bf16.msra.mxu1 %v2822_v28 }
 0x2e8   :  { %2663 = vmatprep.subr.bf16.mxu1 %v2939_v61 }
 0x2eb   :  { %2664 = vmatpush3.bf16.msra.mxu1 %v2823_v29 }
 0x2ec   :  { %2665 = vmatprep.subr.bf16.mxu1 %v2939_v61 }
 0x2ef   :  { %2666 = vmatpush3.bf16.msra.mxu1 %v2824_v30  ;;  %v2893_v30 = vld [vmem:[%s3536_s1 + $0x8] sm:$0xff] }
 0x2f0   :  { %2671 = vmatprep.subr.mxu1 %v2939_v61 }
 0x350   :  { %v1087_v21 = vpop.xlane.xlu1 %1086 }
 0x351   :  { %v1091_v22 = vadd.f32 %v2870_v7, %v1087_v21  ;;  %v854_v7 = vrot.slane %v742_v5, %v3197_v23 }
 0x353   :  { %1393 = vperm.xlu1 %2712, %v1091_v22   ;;  %v862_v10 = vrot.slane %v854_v7, %v3197_v23  ;;  %v855_v28 = vcombine.high %v854_v7, %v854_v7 }
 0x354   :  { %v1090_v25 = vpop.xlane.xlu0 %1089 }
 0x355   :  { %v1092_v27 = vadd.f32 %v2872_v9, %v1090_v25 }
 0x357   :  { %1398 = vperm.xlu1 %2712, %v1092_v27  }
 0x359   :  { %v1675_v31 = vpop.xlane.xlu0 %1674 }
 0x35a   :  { %v1680_v32 = vsub.f32 %v1675_v31, %v1675_v31 }
 0x35c   :  { %v1682_v33 = vmul.f32 1.442695, %v1680_v32 }
 0x35e   :  { %2873 = vpow2.f32 %v1682_v33 }
 0x36b   :  { %v2874_v39 = vpop.eup %2873 }
 0x37b   :  { %1678 = vadd.xlane.f32.xlu1 %v1677_v34  ;;  %v869_v34 = vrot.slane %v855_v28, %v3197_v23 }
 0x386   :  { %v1162_v35 = vpop.f32.mrf.mxu0 }
 0x388   :  { %v2635_v36 = vpop.f32.mrf.mxu0 }
 0x389   :  { %v368_v36 = vsub.s32 5, %v3166_v63 }
 0x38a   :  { %v1235_v40 = vpop.f32.mrf.mxu1 }
 0x38c   :  { %v2640_v43 = vpop.f32.mrf.mxu1  ;;  %1840 = vperm.xlu1 %2712, %v2874_v39  }
 0x38e   :  { %v1312_v45 = vpop.f32.mrf.mxu1 }
 0x38f   :  { %v1313_v48 = vadd.f32 %v1312_v45, %v1162_v35 }
 0x390   :  { %v2645_v49 = vpop.f32.mrf.mxu1 }
 0x392   :  { %v1387_v51 = vpop.f32.mrf.mxu1 }
 0x393   :  { %v1388_v53 = vadd.f32 %v1387_v51, %v1235_v40 }
 0x394   :  { %v2650_v54 = vpop.f32.mrf.mxu1 }
 0x3ce   :  { %v1394_v59 = vpop.permute.xlu1 %1393 }
 0x3cf   :  { %2875 = vrcp.f32 %v1394_v59 }
 0x3d2   :  { %v1399_v60 = vpop.permute.xlu1 %1398 }
 0x3d3   :  { %2877 = vrcp.f32 %v1399_v60 }
 0x3dc   :  { %v2876_v6 = vpop.eup %2875 }
 0x3dd   :  { %v1402_v2 = vmul.f32 %v2876_v6, %v1313_v48 }
 0x3e0   :  { %v2878_v26 = vpop.eup %2877 }
 0x3e1   :  { %v1404_v8 = vmul.f32 %v2878_v26, %v1388_v53 }
 0x3e3   :  { %v1405_v9 = vpack.c.bf16 %v1404_v8, %v1402_v2  ;;  %v2849_v8 = vld [vmem:[%s3538_s3 + $0xf4] ss:$8 sps:$4 sm:$0xff]  }
 0x3e5   :  { %2668 = vmatmul.mubr.bf16.vlgmr.msra.gmra.mxu1 %v1405_v9  ;;  %v2850_v9 = vld [vmem:[%s3538_s3 + $0x74] ss:$8 sps:$4 sm:$0xff]  }
 0x3e6   :  { %2672 = vmatpush3.msk.msra.mxu1 %vm1243_vm3, %v862_v10  ;;  %2673 = vmatprep.mubr.msk.f32.mxu1 %vm2940_vm1, %v2939_v61  ;;  %v2851_v10 = vld [vmem:[%s3538_s3 + $0xe4] ss:$8 sps:$4 sm:$0xff]  }
 0x3e7   :  { %2681 = vmatprep.subr.mxu1 %v2939_v61 }
 0x3ed   :  { %2674 = vmatmul.mubr.msk.f32.vlgmr.msra.gmra.mxu1 %vm1239_vm4, %v2874_v39  ;;  %v369_v39 = vrot.slane %v3192_v19, %v368_v36 }
 0x3ee   :  { %2683 = vmatprep.mubr.msk.f32.mxu1 %vm2940_vm1, %v2939_v61 }
 0x3ef   :  { %v744_v40 = vadd.f32 %v3208_v38, %v369_v39 }
 0x3f1   :  { %v870_v1 = vmul.f32 0.17677669, %v744_v40 }
 0x3f3   :  { %v878_v43 = vrot.slane %v870_v1, %v3197_v23 }
 0x3f5   :  { %v879_v63 = vcombine.high %v878_v43, %v878_v43  ;;  %v886_v19 = vrot.slane %v878_v43, %v3197_v23 }
 0x3f7   :  { %v893_v0 = vrot.slane %v879_v63, %v3197_v23 }
 0x404   :  { %v1679_v14 = vpop.xlane.xlu1 %1678 }
 0x405   :  { %v1681_v15 = vsub.f32 %v1679_v14, %v1679_v14  ;;  %v2856_v14 = vld [vmem:[%s3538_s3 + $0x44] ss:$8 sps:$4 sm:$0xff]  }
 0x407   :  { %v1684_v46 = vmul.f32 1.442695, %v1681_v15  ;;  %v2857_v15 = vld [vmem:[%s3538_s3 + $0xb4] ss:$8 sps:$4 sm:$0xff]  }
 0x409   :  { %2879 = vpow2.f32 %v1684_v46  ;;  %v2860_v46 = vld [vmem:[%s3538_s3 + $0x24] ss:$8 sps:$4 sm:$0xff]  }
 0x4a5   :  { %v1511_v18 = vpop.f32.mrf.mxu1 }
 0x4a6   :  { %v1512_v21 = vadd.f32 %v2487_v16, %v1511_v18  ;;  %v2859_v18 = vld [vmem:[%s3538_s3 + $0xa4] ss:$8 sps:$4 sm:$0xff]  }
 0x4a7   :  { %v2669_v22 = vpop.f32.mrf.mxu1 }
 0x4a8   :  { %v1518_v24 = vadd.f32 %v1512_v21, %v3042_v17  ;;  %v3441_v17 = vpop.eup %2879  ;;  %v2861_v21 = vld [vmem:[%s3538_s3 + $0x94] ss:$8 sps:$4 sm:$0xff]  }
 0x4a9   :  { %v1514_v25 = vpop.f32.mrf.mxu1  ;;  %v2862_v22 = vld [vmem:[%s3538_s3 + $0x14] ss:$8 sps:$4 sm:$0xff]  }
 0x4aa   :  { %2375 = vst [vmem:[#allocation4] sm:$0xff] %v1518_v24  ;;  %v1515_v27 = vadd.f32 %v2487_v16, %v1514_v25  ;;  %v2858_v16 = vld [vmem:[%s3538_s3 + $0x34] ss:$8 sps:$4 sm:$0xff]   ;;  %v2864_v25 = vld [vmem:[%s3538_s3 + $0x4] ss:$8 sps:$4 sm:$0xff]  }
 0x4ab   :  { %v2670_v29 = vpop.f32.mrf.mxu1 }
 0x4ac   :  { %v1519_v31 = vadd.f32 %v2893_v30, %v1515_v27  ;;  %v1841_v30 = vpop.permute.xlu1 %1840 }
 0x4ad   :  { %v3434_v32 = vpop.f32.mrf.mxu1 }
 0x4ae   :  { %v1520_v33 = vpack.c.bf16 %v1519_v31, %v1518_v24  ;;  %2376 = vst [vmem:[#allocation4 + $0x8] sm:$0xff] %v1519_v31  ;;  %v2863_v24 = vld [vmem:[%s3538_s3 + $0x84] ss:$8 sps:$4 sm:$0xff]   ;;  %s2942_s3 = smov [#allocation4]  }
 0x4af   :  { %v2675_v35 = vpop.f32.mrf.mxu1  ;;  %s2394_s0 = sshll.u32 %s2942_s3, 4  ;;  %s2395_s0 = int_to_ptr.vmem [resolvable:$true] %s2394_s0 }
 0x4b0   :  { %1662 = vmatmul.mubr.bf16.vlgmr.msra.gmra.mxu0 %v1520_v33  ;;  %s2894_s23 = scalar_lea.vmem %s2395_s0, 256  ;;  %p2899_p1 = scmp.lt.s32.totalorder %s2395_s0, %s2395_s0 }
 0x4b1   :  { %2677 = vmatpush3.msk.msra.mxu0 %vm1243_vm3, %v869_v34  ;;  %2678 = vmatprep.mubr.msk.f32.mxu0 %vm2940_vm1, %v2939_v61  ;;  %p2895_p0 = scmp.ne.s32.totalorder %s2395_s0, %s2894_s23  ;;  %p2900_p2 = scmp.lt.s32.totalorder %s2894_s23, %s2894_s23 }
 0x4b2   :  { %2686 = vmatprep.subr.mxu0 %v2939_v61 }
 0x4b3   :  { %p2901_p3 = por %p2900_p2, %p2899_p1 }
 0x4b5   :  { %p2902_p4 = pnand %p2901_p3, %p2895_p0 }
 0x4b8   :  { %2679 = vmatmul.mubr.msk.f32.vlgmr.msra.gmra.mxu0 %vm1239_vm4, %v3441_v17 }
 0x4b9   :  { %2688 = vmatprep.mubr.msk.f32.mxu0 %vm2940_vm1, %v2939_v61 }
 0x570   :  { %v1663_v44 = vpop.f32.mrf.mxu0 }
 0x571   :  { %v1664_v45 = vadd.f32 %v1663_v44, %v1542_v42 }
 0x572   :  { %v1665_v48 = vpop.f32.mrf.mxu0 }
 0x573   :  { %2682 = vmatpush3.xpose.msra.mxu1 %v1664_v45  ;;  %v1666_v38 = vadd.f32 %v1665_v48, %v1546_v47 }
 0x574   :  { %v1667_v49 = vpop.f32.mrf.mxu0  ;;  %2691 = vmatprep.subr.mxu1 %v2939_v61 }
 0x575   :  { %v1668_v50 = vadd.f32 %v1667_v49, %v1542_v42 }
 0x576   :  { %v1669_v51 = vpop.f32.mrf.mxu0  ;;  %2684 = vmatmul.mubr.f32.vlgmr.msra.gmra.mxu1 %v886_v19 }
 0x577   :  { %2687 = vmatpush3.xpose.msra.mxu0 %v1668_v50  ;;  %2692 = vmatpush3.msra.mxu1 %v1666_v38  ;;  %v1670_v3 = vadd.f32 %v1669_v51, %v1546_v47 }
 0x578   :  { %v3459_v52 = vpop.f32.mrf.mxu0  ;;  %2696 = vmatprep.subr.mxu0 %v2939_v61  ;;  %2693 = vmatprep.mubr.msk.f32.mxu1 %vm2940_vm1, %v2939_v61 }
 0x579   :  { %2579 = vmatprep.subr.bf16.mxu1 %v2849_v8 }
 0x57a   :  { %v2680_v53 = vpop.f32.mrf.mxu0  ;;  %2689 = vmatmul.mubr.f32.vlgmr.msra.gmra.mxu0 %v893_v0 }
 0x57b   :  { %2697 = vmatpush3.msra.mxu0 %v1670_v3  ;;  %2698 = vmatprep.mubr.msk.f32.mxu0 %vm2940_vm1, %v2939_v61 }
 0x636   :  { %v1918_v54 = vpop.f32.mrf.mxu1 }
 0x637   :  { %v1993_v58 = vsel %vm1992_vm5, %v1918_v54, -inf }
 0x638   :  { %v2685_v55 = vpop.f32.mrf.mxu1 }
 0x63a   :  { %v1988_v20 = vpop.f32.mrf.mxu0 }
 0x63b   :  { %v1996_v56 = vsel %vm1992_vm5, %v1988_v20, -inf }
 0x63c   :  { %1997 = vmax.xlane.f32.xlu0 %v1996_v56  ;;  %v2690_v57 = vpop.f32.mrf.mxu0 }
 0x640   :  { %1994 = vmax.xlane.f32.xlu0 %v1993_v58 }
 0x6c5   :  { %v1998_v59 = vpop.xlane.xlu0 %1997 }
 0x6c6   :  { %v2000_v60 = vsub.f32 %v1988_v20, %v1998_v59 }
 0x6c8   :  { %v2003_v62 = vmul.f32 1.442695, %v2000_v60 }
 0x6c9   :  { %v1995_v4 = vpop.xlane.xlu0 %1994 }
 0x6ca   :  { %2881 = vpow2.f32 %v2003_v62  ;;  %v1999_v5 = vsub.f32 %v1918_v54, %v1995_v4 }
 0x6cc   :  { %v2001_v6 = vmul.f32 1.442695, %v1999_v5 }
 0x6ce   :  { %2883 = vpow2.f32 %v2001_v6 }
 0x6d7   :  { %v2882_v61 = vpop.eup %2881 }
 0x6d8   :  { %2699 = vmatmul.mubr.msk.f32.vlgmr.msra.gmra.mxu0 %vm1052_vm2, %v2882_v61  ;;  %v2154_v2 = vsel %vm1992_vm5, %v2882_v61, 0.0 }
 0x6db   :  { %v2884_v26 = vpop.eup %2883 }
 0x6dc   :  { %2694 = vmatmul.mubr.msk.f32.vlgmr.msra.gmra.mxu1 %vm1052_vm2, %v2884_v26  ;;  %v2151_v7 = vsel %vm1992_vm5, %v2884_v26, 0.0 }
 0x6dd   :  { %2152 = vadd.xlane.f32.xlu0 %v2151_v7  ;;  %2580 = vmatpush3.bf16.msra.mxu1 %v2850_v9 }
 0x6de   :  { %2581 = vmatprep.subr.bf16.mxu1 %v2851_v10 }
 0x6e1   :  { %2155 = vadd.xlane.f32.xlu0 %v2154_v2  ;;  %2582 = vmatpush3.bf16.msra.mxu1 %v2852_v37 }
 0x6e2   :  { %2583 = vmatprep.subr.bf16.mxu1 %v2853_v11 }
 0x6e5   :  { %2584 = vmatpush3.bf16.msra.mxu1 %v2854_v12 }
 0x6e6   :  { %2585 = vmatprep.subr.bf16.mxu1 %v2855_v13 }
 0x6e9   :  { %2586 = vmatpush3.bf16.msra.mxu1 %v2856_v14 }
 0x6ea   :  { %2587 = vmatprep.subr.bf16.mxu1 %v2857_v15 }
 0x6ed   :  { %2588 = vmatpush3.bf16.msra.mxu1 %v2858_v16 }
 0x6ee   :  { %2589 = vmatprep.subr.bf16.mxu1 %v2859_v18 }
 0x6f1   :  { %2590 = vmatpush3.bf16.msra.mxu1 %v2860_v46 }
 0x6f2   :  { %2591 = vmatprep.subr.bf16.mxu1 %v2861_v21 }
 0x6f5   :  { %2592 = vmatpush3.bf16.msra.mxu1 %v2862_v22 }
 0x6f6   :  { %2593 = vmatprep.subr.bf16.mxu1 %v2863_v24 }
 0x6f7   :  { %1845 = vperm.xlu0 %2711, %v3441_v17  }
 0x6f9   :  { %2594 = vmatpush3.bf16.msra.mxu1 %v2864_v25 }
 0x766   :  { %v2153_v27 = vpop.xlane.xlu0 %2152 }
 0x76a   :  { %v2156_v28 = vpop.xlane.xlu0 %2155 }
 0x772   :  { %v1846_v29 = vpop.permute.xlu0 %1845 }
 0x773   :  { %2885 = vrcp.f32 %v1846_v29 }
 0x774   :  { %2887 = vrcp.f32 %v2156_v28 }
 0x775   :  { %2889 = vrcp.f32 %v1841_v30 }
 0x776   :  { %2891 = vrcp.f32 %v2153_v27 }
 0x780   :  { %v2886_v31 = vpop.eup %2885 }
 0x781   :  { %v1851_v33 = vmul.f32 %v2886_v31, %v3459_v52  ;;  %v2888_v34 = vpop.eup %2887 }
 0x782   :  { %v2890_v40 = vpop.eup %2889 }
 0x783   :  { %v2163_v39 = vrot.slane %v1851_v33, 7  ;;  %v2892_v41 = vpop.eup %2891  ;;  %v1849_v1 = vmul.f32 %v2890_v40, %v3434_v32 }
 0x785   :  { %v2164_v47 = vsel %vm381_vm0, %v2163_v39, %v1849_v1 }
 0x786   :  { %v2171_v19 = vpack.c.bf16 %v2164_v47, %v2164_v47 }
 0x798   :  { %v2147_v35 = vpop.f32.mrf.mxu0 }
 0x799   :  { %v2160_v17 = vmul.f32 %v2888_v34, %v2147_v35 }
 0x79a   :  { %v2700_v36 = vpop.f32.mrf.mxu0 }
 0x79b   :  { %v2168_v43 = vrot.slane %v2160_v17, 7 }
 0x79c   :  { %v2074_v42 = vpop.f32.mrf.mxu1 }
 0x79d   :  { %v2158_v44 = vmul.f32 %v2892_v41, %v2074_v42 }
 0x79e   :  { %v2695_v45 = vpop.f32.mrf.mxu1 }
 0x79f   :  { %v2169_v48 = vsel %vm381_vm0, %v2168_v43, %v2158_v44 }
 0x7a0   :  { %v2172_v63 = vpack.c.bf16 %v2169_v48, %v2169_v48 }
 0x7a2   :  { %2340 = vmatprep.mubr.bf16.mxu1 %v2172_v63 }
 0x7a3   :  { %2341 = vmatmul.mubr.bf16.vlgmr.msra.gmra.mxu1 %v2171_v19 }
 0x7a4   :  { %2905 = shalt.err (!%p2902_p4)
}
 0x7a5   :  { %s2943_s24 = smov 128   ;;  %s2944_s25 = smov 8   ;;  %v2518_v49 = vld [vmem:[%s3540_s5 + $0x1] ss:$0 sm:$0xff] }
 0x7a6   :  { %2400 = dma.vmem_to_hbm [thread:$0]  %s2395_s0, 256, %s3542_s7, [#allocation5], %s2943_s24, %s2943_s24, %s2944_s25  }
 0x7a7   :  { %s2945_s30 = smov [#allocation2]  }
 0x7a8   :  { %s2382_s8 = sshll.u32 %s2945_s30, 4  ;;  %s2383_s8 = int_to_ptr.vmem [resolvable:$true] %s2382_s8 }
 0x7a9   :  { %s2914_s9 = scalar_lea.vmem %s2383_s8, 32  ;;  %p2919_p6 = scmp.lt.s32.totalorder %s2383_s8, %s2383_s8 }
 0x7aa   :  { %p2915_p5 = scmp.ne.s32.totalorder %s2383_s8, %s2914_s9  ;;  %p2920_p7 = scmp.lt.s32.totalorder %s2914_s9, %s2914_s9 }
 0x7ac   :  { %p2921_p8 = por %p2920_p7, %p2919_p6 }
 0x7ae   :  { %p2922_p9 = pnand %p2921_p8, %p2915_p5 }
 0x863   :  { %v2595_v32 = vpop.f32.mrf.mxu1 }
 0x865   :  { %v2596_v38 = vpop.f32.mrf.mxu1 }
 0x866   :  { %v2597_v50 = vadd.f32 %v2596_v38, %v2595_v32 }
 0x867   :  { %v2598_v51 = vpop.f32.mrf.mxu1 }
 0x868   :  { %v2343_v0 = vadd.f32 %v2597_v50, %v2518_v49 }
 0x869   :  { %v2599_v52 = vpop.f32.mrf.mxu1 }
 0x86a   :  { %v2355_v3 = vrot.slane %v2343_v0, %v3197_v23 }
 0x86c   :  { %2535 = vst.sshfl [vmem:[#allocation2] sm:$0x1 pattern:$0x73625140] %v2355_v3  ;;  %v2356_v53 = vcombine.high %v2355_v3, %v2355_v3 }
 0x86e   :  { %2536 = vst.sshfl [vmem:[#allocation2 + $0x1] sm:$0x1 pattern:$0x73625140] %v2356_v53 }
 0x86f   :  { %2925 = shalt.err (!%p2922_p9)
}
 0x870   :  { %s2946_s5 = smov 16   ;;  %s2947_s7 = smov 1  }
 0x871   :  { %2388 = dma.vmem_to_hbm [thread:$0]  %s2383_s8, 32, %s3541_s6, [#allocation3], %s2946_s5, %s2946_s5, %s2947_s7  }
 0x872   :  { %2934 = dma.done.wait [#allocation3], 32  }
 0x873   :  { %2935 = vsyncadd [#allocation3], 4294967264 }
 0x874   :  { %2936 = dma.done.wait [#allocation5], 256  }
 0x875   :  { %2937 = vsyncadd [#allocation5], 4294967040 }
 0x876   :  { %2407 = vsyncpa [#allocation3], 1 }
 0x877   :  { %2408 = vsyncpa [#allocation5], 1 }

</bundles_post_ra>
